<compile_context>
chip_gen: v7x
topology: tpu7x:2x2x1
jax: 0.10.0
libtpu: 0.0.40
codegen_flags: <defaults>
</compile_context>

<pallas_src>
import functools

import jax
import jax.numpy as jnp
from jax import lax
from jax.experimental import pallas as pl
from jax.experimental.pallas import tpu as pltpu

# Hyper-parameters referenced by the PyTorch module's defaults.
GNN_LAYERS = 3
TEMPERATURE_INITIAL = 0.2
DROPOUT_RATE = 0.0


# ---------------------------------------------------------------------------
# Helpers: padding / VMEM planning.
# ---------------------------------------------------------------------------
def _round_up(x, m):
    return ((x + m - 1) // m) * m


def _pad2d(x, rows, cols):
    r, c = x.shape
    return jnp.pad(x, ((0, rows - r), (0, cols - c)))


def _pad_rows(n):
    # Small graphs: lane/sublane pad only.  Large graphs: pad to a 512 multiple so
    # tm=512 tiles divide evenly and the "parallel" row grid is >= 2 (v7x 2 TCs).
    if n <= 512:
        return _round_up(n, 128)
    return _round_up(n, 512)


def _vmem_budget_bytes():
    """Per-generation VMEM budget (explicit, instead of the default scoped limit)."""
    try:
        phys = int(pltpu.get_tpu_info().vmem_capacity_bytes)
    except Exception:
        phys = 64 << 20  # conservative fallback, safe on every generation
    if phys <= (64 << 20):       # v7x-class: 64 MiB physical -> cap ~44 MiB
        return 44 << 20
    return 96 << 20              # v5e / v6e: 128 MiB physical -> use 96 MiB


def _make_plan(m, kdim, d, budget):
    """Choose (tm, tk, resident_h) for an (m, kdim) x (kdim, d) propagation."""
    # Row tile: biggest of 512/256/128 dividing m, preferring a row grid >= 2.
    tm = 128
    for cand in (512, 256, 128):
        if m % cand == 0 and m // cand >= 2:
            tm = cand
            break
    else:
        for cand in (512, 256, 128):
            if m % cand == 0:
                tm = cand
                break

    # Fixed, row-tile-sized VMEM working set (double-buffered blocks + f32 scratch).
    fixed = (2 * tm * d * 4          # acc_in
             + 2 * tm * d * 4        # acc_out
             + 2 * tm * d * 2        # h_new
             + tm * d * 4            # f32 accumulator scratch
             + 2 * tm * 128 * 4)     # (tm, 1) row-scale, lane-padded

    # Keep h fully VMEM-resident (DMA'd once) when it comfortably fits the budget.
    resident_bytes = 2 * kdim * d * 2          # bf16, assume double-buffered
    resident_h = resident_bytes <= min(24 << 20, max(budget - fixed - (8 << 20), 0))

    avail = budget - fixed - (resident_bytes if resident_h else 0)
    tk = 128
    for cand in (2048, 1024, 512, 256, 128):
        if kdim % cand:
            continue
        b_bytes = 2 * tm * cand                # int8 B tiles, double-buffered
        cast_bytes = 6 * tm * cand             # worst-case f32+bf16 cast intermediates
        h_bytes = 0 if resident_h else 2 * cand * d * 2
        if b_bytes + cast_bytes + h_bytes <= avail:
            tk = cand
            break
    return tm, tk, resident_h


# ---------------------------------------------------------------------------
# Pallas kernel: one propagation direction.
#   acc_scratch  = sum_k  B_blk @ h_blk              (bf16 MXU, f32 accumulate)
#   new_h        = row_scale * acc_scratch           (= A @ h  exactly)
#   h_new_out    = row_scale * new_h   (pre-scaled for the next layer's contraction)
#   acc_out      = (acc_in + new_h) * layer_scale    (running layer-mean, fused)
# ---------------------------------------------------------------------------
def _prop_kernel(scale_ref, b_ref, h_ref, rs_ref, acc_in_ref, *refs,
                 transpose_b, resident_h, tk, emit_h_new):
    if emit_h_new:
        h_new_ref, acc_out_ref, acc_scratch = refs
    else:
        acc_out_ref, acc_scratch = refs
        h_new_ref = None

    k = pl.program_id(1)

    @pl.when(k == 0)
    def _():
        acc_scratch[...] = jnp.zeros_like(acc_scratch)

    if resident_h:
        # h is fully VMEM-resident; take the current (tk, d) slab (aligned slice).
        off = pl.multiple_of(k * tk, tk)
        h_blk = h_ref[pl.ds(off, tk), :]
    else:
        h_blk = h_ref[...]

    # int8 B tile -> bf16 on the VPU (values are exact 0/1), then MXU matmul.
    b_blk = b_ref[...].astype(jnp.float32).astype(jnp.bfloat16)
    if transpose_b:
        # b_blk is a (tk, tm) slab of B_ui; contract over axis 0  (B.T @ h).
        contrib = lax.dot_general(b_blk, h_blk, (((0,), (0,)), ((), ())),
                                  preferred_element_type=jnp.float32)
    else:
        contrib = jnp.dot(b_blk, h_blk, preferred_element_type=jnp.float32)
    acc_scratch[...] += contrib

    @pl.when(k == pl.num_programs(1) - 1)
    def _():
        rs = rs_ref[...]                       # (tm, 1): 1/sqrt(deg) of output rows
        new_h = acc_scratch[...] * rs          # exact LightGCN layer output
        if h_new_ref is not None:
            # The next layer contracts this output scaled by the SAME 1/sqrt(deg),
            # so store it pre-scaled (saves a full re-scaling pass per layer).
            h_new_ref[...] = (new_h * rs).astype(h_new_ref.dtype)
        acc_out_ref[...] = ((acc_in_ref[...] + new_h)
                            * scale_ref[0]).astype(acc_out_ref.dtype)


def _propagate_one_side(b_ui, h_scaled, row_scale, acc, layer_scale, *,
                        transpose_b, emit_h_new, plan, vmem_limit):
    """One LightGCN direction on the bipartite block; all dims multiples of 128."""
    tm, tk, resident_h = plan
    if transpose_b:
        kdim, m = b_ui.shape
    else:
        m, kdim = b_ui.shape
    d = h_scaled.shape[1]
    grid = (m // tm, kdim // tk)

    if transpose_b:
        b_spec = pl.BlockSpec((tk, tm), lambda i, k: (k, i))   # A.T via index_map
    else:
        b_spec = pl.BlockSpec((tm, tk), lambda i, k: (i, k))
    if resident_h:
        h_spec = pl.BlockSpec((kdim, d), lambda i, k: (0, 0))  # DMA'd once, resident
    else:
        h_spec = pl.BlockSpec((tk, d), lambda i, k: (k, 0))

    in_specs = [
        pl.BlockSpec(memory_space=pltpu.MemorySpace.SMEM),     # layer-mean scale
        b_spec,                                                # int8 B tiles (streamed)
        h_spec,                                                # bf16 col-scaled h
        pl.BlockSpec((tm, 1), lambda i, k: (i, 0)),            # 1/sqrt(deg) of rows
        pl.BlockSpec((tm, d), lambda i, k: (i, 0)),            # running-mean acc in
    ]
    out_shapes = []
    out_specs = []
    if emit_h_new:
        out_shapes.append(jax.ShapeDtypeStruct((m, d), jnp.bfloat16))
        out_specs.append(pl.BlockSpec((tm, d), lambda i, k: (i, 0)))
    out_shapes.append(jax.ShapeDtypeStruct((m, d), jnp.float32))
    out_specs.append(pl.BlockSpec((tm, d), lambda i, k: (i, 0)))

    kernel = functools.partial(_prop_kernel, transpose_b=transpose_b,
                               resident_h=resident_h, tk=tk,
                               emit_h_new=emit_h_new)
    outs = pl.pallas_call(
        kernel,
        out_shape=tuple(out_shapes),
        grid_spec=pltpu.PrefetchScalarGridSpec(
            num_scalar_prefetch=0,
            grid=grid,
            in_specs=in_specs,
            out_specs=out_specs,
            scratch_shapes=[pltpu.VMEM((tm, d), jnp.float32)],
        ),
        compiler_params=pltpu.CompilerParams(
            dimension_semantics=("parallel", "arbitrary"),
            vmem_limit_bytes=vmem_limit),
        input_output_aliases={4: (1 if emit_h_new else 0)},   # acc updates in place
    )(layer_scale, b_ui, h_scaled, row_scale, acc)
    if emit_h_new:
        return outs[0], outs[1]
    return None, outs[0]


@functools.partial(jax.jit,
                   static_argnames=("num_layers", "plan_fwd", "plan_bwd",
                                    "vmem_limit"))
def _lightgcn_propagate(b_ui, inv_sq_u, inv_sq_i, user_e0, item_e0, *,
                        num_layers, plan_fwd, plan_bwd, vmem_limit):
    """L LightGCN layers on the bipartite graph + mean over layer outputs."""
    acc_u = user_e0.astype(jnp.float32)      # layer-0 contribution
    acc_i = item_e0.astype(jnp.float32)
    if num_layers == 0:
        return acc_u, acc_i

    # Layer-0 inputs, pre-scaled by the column normalization (exact f32 scales),
    # cast to bf16 for the MXU.
    h_u = (user_e0 * inv_sq_u).astype(jnp.bfloat16)
    h_i = (item_e0 * inv_sq_i).astype(jnp.bfloat16)

    one = jnp.ones((1,), jnp.float32)
    last = jnp.full((1,), 1.0 / (num_layers + 1), jnp.float32)
    for layer in range(num_layers):
        is_last = layer == num_layers - 1
        scale = last if is_last else one
        new_u, acc_u = _propagate_one_side(
            b_ui, h_i, inv_sq_u, acc_u, scale, transpose_b=False,
            emit_h_new=not is_last, plan=plan_fwd, vmem_limit=vmem_limit)
        new_i, acc_i = _propagate_one_side(
            b_ui, h_u, inv_sq_i, acc_i, scale, transpose_b=True,
            emit_h_new=not is_last, plan=plan_bwd, vmem_limit=vmem_limit)
        h_u, h_i = new_u, new_i
    return acc_u, acc_i


# ---------------------------------------------------------------------------
# SGL_GNN wrapper (forward, for_contrastive=False path).
# ---------------------------------------------------------------------------
class SGL_GNN_Pallas:
    def __init__(self, num_users, num_items, embedding_dim,
                 initial_user_embeddings, initial_item_embeddings,
                 interactions, num_layers=GNN_LAYERS,
                 sgl_temp=TEMPERATURE_INITIAL, sgl_dropout_rate=DROPOUT_RATE):
        self.num_users = num_users
        self.num_items = num_items
        self.embedding_dim = embedding_dim
        self.num_layers = num_layers
        self.sgl_temp = sgl_temp
        self.sgl_dropout_rate = sgl_dropout_rate

        self.user_embeds = initial_user_embeddings     # nn.Parameter equivalent
        self.item_embeds = initial_item_embeddings     # nn.Parameter equivalent

        self.u_pad = _pad_rows(num_users)
        self.i_pad = _pad_rows(num_items)
        self.d_pad = _round_up(embedding_dim, 128)

        # Exact factorization A_ui = D_u^-1/2 * B * D_i^-1/2 :
        #   B stored as int8 (binary interactions -> exact, half the bytes of bf16),
        #   degree scales stored as f32 vectors.  A.T is never materialized.
        inter = jnp.asarray(interactions, jnp.float32)
        deg_u = jnp.maximum(inter.sum(axis=1), 1.0)   # matches out_degrees().clamp(1)
        deg_i = jnp.maximum(inter.sum(axis=0), 1.0)   # matches in_degrees().clamp(1)
        self.b_ui = _pad2d(jnp.rint(inter).astype(jnp.int8), self.u_pad, self.i_pad)
        self.inv_sq_u = _pad2d((1.0 / jnp.sqrt(deg_u))[:, None], self.u_pad, 1)
        self.inv_sq_i = _pad2d((1.0 / jnp.sqrt(deg_i))[:, None], self.i_pad, 1)

        budget = _vmem_budget_bytes()
        self.vmem_limit = int(budget)
        self.plan_fwd = _make_plan(self.u_pad, self.i_pad, self.d_pad, budget)
        self.plan_bwd = _make_plan(self.i_pad, self.u_pad, self.d_pad, budget)

    def forward_gnn(self, user_embeds, item_embeds):
        ue = _pad2d(jnp.asarray(user_embeds, jnp.float32), self.u_pad, self.d_pad)
        ie = _pad2d(jnp.asarray(item_embeds, jnp.float32), self.i_pad, self.d_pad)
        acc_u, acc_i = _lightgcn_propagate(
            self.b_ui, self.inv_sq_u, self.inv_sq_i, ue, ie,
            num_layers=self.num_layers, plan_fwd=self.plan_fwd,
            plan_bwd=self.plan_bwd, vmem_limit=self.vmem_limit)
        return (acc_u[:self.num_users, :self.embedding_dim],
                acc_i[:self.num_items, :self.embedding_dim])

    def forward(self, user_indices=None, item_indices=None):
        users, items = self.forward_gnn(self.user_embeds, self.item_embeds)
        if user_indices is not None:
            users = users[user_indices]
        if item_indices is not None:
            items = items[item_indices]
        return users, items


# ---------------------------------------------------------------------------
# Pure-JAX f32 reference (full dense A_norm) for correctness checking.
# ---------------------------------------------------------------------------
def _build_dense_normalized_adjacency(interactions, num_users, num_items):
    n = num_users + num_items
    adj = jnp.zeros((n, n), jnp.float32)
    adj = adj.at[:num_users, num_users:].set(interactions)
    adj = adj.at[num_users:, :num_users].set(interactions.T)
    out_deg = jnp.maximum(adj.sum(axis=1), 1.0)
    in_deg = jnp.maximum(adj.sum(axis=0), 1.0)
    return adj.T / jnp.sqrt(out_deg)[None, :] / jnp.sqrt(in_deg)[:, None]


def _reference_forward(a_norm, e0, num_layers):
    layer_embs = [e0]
    h = e0
    for _ in range(num_layers):
        h = a_norm @ h
        layer_embs.append(h)
    return jnp.mean(jnp.stack(layer_embs, axis=1), axis=1)


if __name__ == "__main__":
    num_users, num_items, embedding_dim = 16, 16, 32
    key = jax.random.PRNGKey(0)
    k_inter, k_user, k_item = jax.random.split(key, 3)

    interactions = jax.random.bernoulli(
        k_inter, 0.3, (num_users, num_items)).astype(jnp.float32)
    init_user = jax.random.normal(k_user, (num_users, embedding_dim),
                                  jnp.float32) * 0.1
    init_item = jax.random.normal(k_item, (num_items, embedding_dim),
                                  jnp.float32) * 0.1

    model = SGL_GNN_Pallas(num_users, num_items, embedding_dim,
                           init_user, init_item, interactions,
                           num_layers=GNN_LAYERS)

    user_out, item_out = model.forward()
    user_out = jax.block_until_ready(user_out)
    item_out = jax.block_until_ready(item_out)

    # Verify against the plain-JAX f32 reference (also validates the int8-binary
    # factorization and the transposed-index_map direction).
    a_norm = _build_dense_normalized_adjacency(interactions, num_users, num_items)
    e0 = jnp.concatenate([init_user, init_item], axis=0)
    ref = _reference_forward(a_norm, e0, GNN_LAYERS)
    ref_users, ref_items = ref[:num_users], ref[num_users:]
    assert jnp.allclose(user_out, ref_users, atol=2e-2, rtol=5e-2), (
        float(jnp.max(jnp.abs(user_out - ref_users))))
    assert jnp.allclose(item_out, ref_items, atol=2e-2, rtol=5e-2), (
        float(jnp.max(jnp.abs(item_out - ref_items))))

    print("KERNEL_OK")
</pallas_src>

<mosaic_0001>
module attributes {stable_mosaic.version = 11 : i64} {
  func.func @_prop_kernel(%arg0: i32, %arg1: i32, %arg2: memref<1xf32, #tpu.memory_space<smem>>, %arg3: memref<128x128xi8, #tpu.memory_space<vmem>>, %arg4: memref<128x128xbf16, #tpu.memory_space<vmem>>, %arg5: memref<128x1xf32, #tpu.memory_space<vmem>>, %arg6: memref<128x128xf32, #tpu.memory_space<vmem>>, %arg7: memref<128x128xbf16, #tpu.memory_space<vmem>>, %arg8: memref<128x128xf32, #tpu.memory_space<vmem>>, %arg9: memref<128x128xf32, #tpu.memory_space<vmem>>) attributes {dimension_semantics = [#tpu.dimension_semantics<parallel>, #tpu.dimension_semantics<arbitrary>], iteration_bounds = array<i64: 1, 1>, scalar_prefetch = 0 : i64, scratch_operands = 1 : i64, tpu.core_type = #tpu.core_type<tc>, window_params = [{transform_indices = @transform_0, window_bounds = array<i64: 1>}, {transform_indices = @transform_1, window_bounds = array<i64: 128, 128>}, {pipeline_mode = #tpu.pipeline_mode<synchronous>, transform_indices = @transform_2, window_bounds = array<i64: 128, 128>}, {transform_indices = @transform_3, window_bounds = array<i64: 128, 1>}, {transform_indices = @transform_4, window_bounds = array<i64: 128, 128>}, {transform_indices = @transform_5, window_bounds = array<i64: 128, 128>}, {transform_indices = @transform_6, window_bounds = array<i64: 128, 128>}]} {
    %c0_i32 = arith.constant 0 : i32
    %0 = arith.cmpi eq, %arg1, %c0_i32 : i32
    %1 = arith.extui %0 : i1 to i32
    %c0_i32_0 = arith.constant 0 : i32
    %2 = arith.cmpi ne, %1, %c0_i32_0 : i32
    scf.if %2 {
      %cst_9 = arith.constant 0.000000e+00 : f32
      %17 = vector.broadcast %cst_9 : f32 to vector<128x128xf32>
      %c0_10 = arith.constant 0 : index
      %c0_11 = arith.constant 0 : index
      %18 = vector.load %arg9[%c0_10, %c0_11] : memref<128x128xf32, #tpu.memory_space<vmem>>, vector<128x128xf32>
      tpu.vector_store %arg9[%c0_10, %c0_11], %17 {strides = array<i32>} : memref<128x128xf32, #tpu.memory_space<vmem>>, vector<128x128xf32>,
    } else {
    }
    %c128_i32 = arith.constant 128 : i32
    %3 = arith.muli %arg1, %c128_i32 : i32
    %4 = tpu.assume_multiple %3, 128 : i32
    %5 = arith.index_cast %4 : i32 to index
    %c0 = arith.constant 0 : index
    %6 = vector.load %arg4[%5, %c0] : memref<128x128xbf16, #tpu.memory_space<vmem>>, vector<128x128xbf16>
    %c0_1 = arith.constant 0 : index
    %c0_2 = arith.constant 0 : index
    %7 = vector.load %arg3[%c0_1, %c0_2] : memref<128x128xi8, #tpu.memory_space<vmem>>, vector<128x128xi8>
    %8 = arith.sitofp %7 : vector<128x128xi8> to vector<128x128xf32>
    %9 = arith.truncf %8 : vector<128x128xf32> to vector<128x128xbf16>
    %cst = arith.constant dense<0.000000e+00> : vector<128x128xf32>
    %10 = tpu.matmul %9, %6, %cst {dimension_numbers = #tpu.dot_dimension_numbers<[0], [0], [1], [1], [0, 1, 1, 1], [], []>} : vector<128x128xbf16>, vector<128x128xbf16>, vector<128x128xf32> -> vector<128x128xf32>
    %c0_3 = arith.constant 0 : index
    %c0_4 = arith.constant 0 : index
    %11 = vector.load %arg9[%c0_3, %c0_4] : memref<128x128xf32, #tpu.memory_space<vmem>>, vector<128x128xf32>
    %12 = arith.addf %11, %10 : vector<128x128xf32>
    %c0_5 = arith.constant 0 : index
    %c0_6 = arith.constant 0 : index
    %13 = vector.load %arg9[%c0_5, %c0_6] : memref<128x128xf32, #tpu.memory_space<vmem>>, vector<128x128xf32>
    tpu.vector_store %arg9[%c0_5, %c0_6], %12 {strides = array<i32>} : memref<128x128xf32, #tpu.memory_space<vmem>>, vector<128x128xf32>,
    %c0_i32_7 = arith.constant 0 : i32
    %14 = arith.cmpi eq, %arg1, %c0_i32_7 : i32
    %15 = arith.extui %14 : i1 to i32
    %c0_i32_8 = arith.constant 0 : i32
    %16 = arith.cmpi ne, %15, %c0_i32_8 : i32
    scf.if %16 {
      %c0_9 = arith.constant 0 : index
      %c0_10 = arith.constant 0 : index
      %17 = vector.load %arg5[%c0_9, %c0_10] : memref<128x1xf32, #tpu.memory_space<vmem>>, vector<128x1xf32>
      %c0_11 = arith.constant 0 : index
      %c0_12 = arith.constant 0 : index
      %18 = vector.load %arg9[%c0_11, %c0_12] : memref<128x128xf32, #tpu.memory_space<vmem>>, vector<128x128xf32>
      %19 = vector.broadcast %17 : vector<128x1xf32> to vector<128x128xf32>
      %20 = arith.mulf %18, %19 : vector<128x128xf32>
      %21 = vector.broadcast %17 : vector<128x1xf32> to vector<128x128xf32>
      %22 = arith.mulf %20, %21 : vector<128x128xf32>
      %23 = arith.truncf %22 : vector<128x128xf32> to vector<128x128xbf16>
      %c0_13 = arith.constant 0 : index
      %c0_14 = arith.constant 0 : index
      %24 = vector.load %arg7[%c0_13, %c0_14] : memref<128x128xbf16, #tpu.memory_space<vmem>>, vector<128x128xbf16>
      tpu.vector_store %arg7[%c0_13, %c0_14], %23 {strides = array<i32>} : memref<128x128xbf16, #tpu.memory_space<vmem>>, vector<128x128xbf16>,
      %c0_15 = arith.constant 0 : index
      %c0_16 = arith.constant 0 : index
      %25 = vector.load %arg6[%c0_15, %c0_16] : memref<128x128xf32, #tpu.memory_space<vmem>>, vector<128x128xf32>
      %26 = arith.addf %25, %20 : vector<128x128xf32>
      %c0_17 = arith.constant 0 : index
      %27 = memref.load %arg2[%c0_17] : memref<1xf32, #tpu.memory_space<smem>>
      %28 = vector.broadcast %27 : f32 to vector<128x128xf32>
      %29 = arith.mulf %26, %28 : vector<128x128xf32>
      %c0_18 = arith.constant 0 : index
      %c0_19 = arith.constant 0 : index
      %30 = vector.load %arg8[%c0_18, %c0_19] : memref<128x128xf32, #tpu.memory_space<vmem>>, vector<128x128xf32>
      tpu.vector_store %arg8[%c0_18, %c0_19], %29 {strides = array<i32>} : memref<128x128xf32, #tpu.memory_space<vmem>>, vector<128x128xf32>,
    } else {
    }
    return
  }
  func.func @transform_0(%arg0: i32, %arg1: i32) -> i32 {
    %c0_i32 = arith.constant 0 : i32
    %c0_i32_0 = arith.constant 0 : i32
    return %c0_i32 : i32
  }
  func.func @transform_1(%arg0: i32, %arg1: i32) -> (i32, i32) {
    %c0_i32 = arith.constant 0 : i32
    return %arg1, %arg0 : i32, i32
  }
  func.func @transform_2(%arg0: i32, %arg1: i32) -> (i32, i32) {
    %c0_i32 = arith.constant 0 : i32
    %c0_i32_0 = arith.constant 0 : i32
    %c0_i32_1 = arith.constant 0 : i32
    return %c0_i32, %c0_i32_0 : i32, i32
  }
  func.func @transform_3(%arg0: i32, %arg1: i32) -> (i32, i32) {
    %c0_i32 = arith.constant 0 : i32
    %c0_i32_0 = arith.constant 0 : i32
    return %arg0, %c0_i32 : i32, i32
  }
  func.func @transform_4(%arg0: i32, %arg1: i32) -> (i32, i32) {
    %c0_i32 = arith.constant 0 : i32
    %c0_i32_0 = arith.constant 0 : i32
    return %arg0, %c0_i32 : i32, i32
  }
  func.func @transform_5(%arg0: i32, %arg1: i32) -> (i32, i32) {
    %c0_i32 = arith.constant 0 : i32
    %c0_i32_0 = arith.constant 0 : i32
    return %arg0, %c0_i32 : i32, i32
  }
  func.func @transform_6(%arg0: i32, %arg1: i32) -> (i32, i32) {
    %c0_i32 = arith.constant 0 : i32
    %c0_i32_0 = arith.constant 0 : i32
    return %arg0, %c0_i32 : i32, i32
  }
}

module attributes {stable_mosaic.version = 11 : i64} {
  func.func @_prop_kernel(%arg0: i32, %arg1: i32, %arg2: memref<1xf32, #tpu.memory_space<smem>>, %arg3: memref<128x128xi8, #tpu.memory_space<vmem>>, %arg4: memref<128x128xbf16, #tpu.memory_space<vmem>>, %arg5: memref<128x1xf32, #tpu.memory_space<vmem>>, %arg6: memref<128x128xf32, #tpu.memory_space<vmem>>, %arg7: memref<128x128xbf16, #tpu.memory_space<vmem>>, %arg8: memref<128x128xf32, #tpu.memory_space<vmem>>, %arg9: memref<128x128xf32, #tpu.memory_space<vmem>>) attributes {dimension_semantics = [#tpu.dimension_semantics<parallel>, #tpu.dimension_semantics<arbitrary>], iteration_bounds = array<i64: 1, 1>, scalar_prefetch = 0 : i64, scratch_operands = 1 : i64, tpu.core_type = #tpu.core_type<tc>, window_params = [{transform_indices = @transform_0, window_bounds = array<i64: 1>}, {transform_indices = @transform_1, window_bounds = array<i64: 128, 128>}, {pipeline_mode = #tpu.pipeline_mode<synchronous>, transform_indices = @transform_2, window_bounds = array<i64: 128, 128>}, {transform_indices = @transform_3, window_bounds = array<i64: 128, 1>}, {transform_indices = @transform_4, window_bounds = array<i64: 128, 128>}, {transform_indices = @transform_5, window_bounds = array<i64: 128, 128>}, {transform_indices = @transform_6, window_bounds = array<i64: 128, 128>}]} {
    %c0_i32 = arith.constant 0 : i32
    %0 = arith.cmpi eq, %arg1, %c0_i32 : i32
    %1 = arith.extui %0 : i1 to i32
    %c0_i32_0 = arith.constant 0 : i32
    %2 = arith.cmpi ne, %1, %c0_i32_0 : i32
    scf.if %2 {
      %cst_9 = arith.constant 0.000000e+00 : f32
      %17 = vector.broadcast %cst_9 : f32 to vector<128x128xf32>
      %c0_10 = arith.constant 0 : index
      %c0_11 = arith.constant 0 : index
      %18 = vector.load %arg9[%c0_10, %c0_11] : memref<128x128xf32, #tpu.memory_space<vmem>>, vector<128x128xf32>
      tpu.vector_store %arg9[%c0_10, %c0_11], %17 {strides = array<i32>} : memref<128x128xf32, #tpu.memory_space<vmem>>, vector<128x128xf32>,
    } else {
    }
    %c128_i32 = arith.constant 128 : i32
    %3 = arith.muli %arg1, %c128_i32 : i32
    %4 = tpu.assume_multiple %3, 128 : i32
    %5 = arith.index_cast %4 : i32 to index
    %c0 = arith.constant 0 : index
    %6 = vector.load %arg4[%5, %c0] : memref<128x128xbf16, #tpu.memory_space<vmem>>, vector<128x128xbf16>
    %c0_1 = arith.constant 0 : index
    %c0_2 = arith.constant 0 : index
    %7 = vector.load %arg3[%c0_1, %c0_2] : memref<128x128xi8, #tpu.memory_space<vmem>>, vector<128x128xi8>
    %8 = arith.sitofp %7 : vector<128x128xi8> to vector<128x128xf32>
    %9 = arith.truncf %8 : vector<128x128xf32> to vector<128x128xbf16>
    %cst = arith.constant dense<0.000000e+00> : vector<128x128xf32>
    %10 = tpu.matmul %9, %6, %cst {dimension_numbers = #tpu.dot_dimension_numbers<[1], [0], [0], [1], [0, 0, 1, 1], [], []>} : vector<128x128xbf16>, vector<128x128xbf16>, vector<128x128xf32> -> vector<128x128xf32>
    %c0_3 = arith.constant 0 : index
    %c0_4 = arith.constant 0 : index
    %11 = vector.load %arg9[%c0_3, %c0_4] : memref<128x128xf32, #tpu.memory_space<vmem>>, vector<128x128xf32>
    %12 = arith.addf %11, %10 : vector<128x128xf32>
    %c0_5 = arith.constant 0 : index
    %c0_6 = arith.constant 0 : index
    %13 = vector.load %arg9[%c0_5, %c0_6] : memref<128x128xf32, #tpu.memory_space<vmem>>, vector<128x128xf32>
    tpu.vector_store %arg9[%c0_5, %c0_6], %12 {strides = array<i32>} : memref<128x128xf32, #tpu.memory_space<vmem>>, vector<128x128xf32>,
    %c0_i32_7 = arith.constant 0 : i32
    %14 = arith.cmpi eq, %arg1, %c0_i32_7 : i32
    %15 = arith.extui %14 : i1 to i32
    %c0_i32_8 = arith.constant 0 : i32
    %16 = arith.cmpi ne, %15, %c0_i32_8 : i32
    scf.if %16 {
      %c0_9 = arith.constant 0 : index
      %c0_10 = arith.constant 0 : index
      %17 = vector.load %arg5[%c0_9, %c0_10] : memref<128x1xf32, #tpu.memory_space<vmem>>, vector<128x1xf32>
      %c0_11 = arith.constant 0 : index
      %c0_12 = arith.constant 0 : index
      %18 = vector.load %arg9[%c0_11, %c0_12] : memref<128x128xf32, #tpu.memory_space<vmem>>, vector<128x128xf32>
      %19 = vector.broadcast %17 : vector<128x1xf32> to vector<128x128xf32>
      %20 = arith.mulf %18, %19 : vector<128x128xf32>
      %21 = vector.broadcast %17 : vector<128x1xf32> to vector<128x128xf32>
      %22 = arith.mulf %20, %21 : vector<128x128xf32>
      %23 = arith.truncf %22 : vector<128x128xf32> to vector<128x128xbf16>
      %c0_13 = arith.constant 0 : index
      %c0_14 = arith.constant 0 : index
      %24 = vector.load %arg7[%c0_13, %c0_14] : memref<128x128xbf16, #tpu.memory_space<vmem>>, vector<128x128xbf16>
      tpu.vector_store %arg7[%c0_13, %c0_14], %23 {strides = array<i32>} : memref<128x128xbf16, #tpu.memory_space<vmem>>, vector<128x128xbf16>,
      %c0_15 = arith.constant 0 : index
      %c0_16 = arith.constant 0 : index
      %25 = vector.load %arg6[%c0_15, %c0_16] : memref<128x128xf32, #tpu.memory_space<vmem>>, vector<128x128xf32>
      %26 = arith.addf %25, %20 : vector<128x128xf32>
      %c0_17 = arith.constant 0 : index
      %27 = memref.load %arg2[%c0_17] : memref<1xf32, #tpu.memory_space<smem>>
      %28 = vector.broadcast %27 : f32 to vector<128x128xf32>
      %29 = arith.mulf %26, %28 : vector<128x128xf32>
      %c0_18 = arith.constant 0 : index
      %c0_19 = arith.constant 0 : index
      %30 = vector.load %arg8[%c0_18, %c0_19] : memref<128x128xf32, #tpu.memory_space<vmem>>, vector<128x128xf32>
      tpu.vector_store %arg8[%c0_18, %c0_19], %29 {strides = array<i32>} : memref<128x128xf32, #tpu.memory_space<vmem>>, vector<128x128xf32>,
    } else {
    }
    return
  }
  func.func @transform_0(%arg0: i32, %arg1: i32) -> i32 {
    %c0_i32 = arith.constant 0 : i32
    %c0_i32_0 = arith.constant 0 : i32
    return %c0_i32 : i32
  }
  func.func @transform_1(%arg0: i32, %arg1: i32) -> (i32, i32) {
    %c0_i32 = arith.constant 0 : i32
    return %arg0, %arg1 : i32, i32
  }
  func.func @transform_2(%arg0: i32, %arg1: i32) -> (i32, i32) {
    %c0_i32 = arith.constant 0 : i32
    %c0_i32_0 = arith.constant 0 : i32
    %c0_i32_1 = arith.constant 0 : i32
    return %c0_i32, %c0_i32_0 : i32, i32
  }
  func.func @transform_3(%arg0: i32, %arg1: i32) -> (i32, i32) {
    %c0_i32 = arith.constant 0 : i32
    %c0_i32_0 = arith.constant 0 : i32
    return %arg0, %c0_i32 : i32, i32
  }
  func.func @transform_4(%arg0: i32, %arg1: i32) -> (i32, i32) {
    %c0_i32 = arith.constant 0 : i32
    %c0_i32_0 = arith.constant 0 : i32
    return %arg0, %c0_i32 : i32, i32
  }
  func.func @transform_5(%arg0: i32, %arg1: i32) -> (i32, i32) {
    %c0_i32 = arith.constant 0 : i32
    %c0_i32_0 = arith.constant 0 : i32
    return %arg0, %c0_i32 : i32, i32
  }
  func.func @transform_6(%arg0: i32, %arg1: i32) -> (i32, i32) {
    %c0_i32 = arith.constant 0 : i32
    %c0_i32_0 = arith.constant 0 : i32
    return %arg0, %c0_i32 : i32, i32
  }
}

module attributes {stable_mosaic.version = 11 : i64} {
  func.func @_prop_kernel(%arg0: i32, %arg1: i32, %arg2: memref<1xf32, #tpu.memory_space<smem>>, %arg3: memref<128x128xi8, #tpu.memory_space<vmem>>, %arg4: memref<128x128xbf16, #tpu.memory_space<vmem>>, %arg5: memref<128x1xf32, #tpu.memory_space<vmem>>, %arg6: memref<128x128xf32, #tpu.memory_space<vmem>>, %arg7: memref<128x128xf32, #tpu.memory_space<vmem>>, %arg8: memref<128x128xf32, #tpu.memory_space<vmem>>) attributes {dimension_semantics = [#tpu.dimension_semantics<parallel>, #tpu.dimension_semantics<arbitrary>], iteration_bounds = array<i64: 1, 1>, scalar_prefetch = 0 : i64, scratch_operands = 1 : i64, tpu.core_type = #tpu.core_type<tc>, window_params = [{transform_indices = @transform_0, window_bounds = array<i64: 1>}, {transform_indices = @transform_1, window_bounds = array<i64: 128, 128>}, {pipeline_mode = #tpu.pipeline_mode<synchronous>, transform_indices = @transform_2, window_bounds = array<i64: 128, 128>}, {transform_indices = @transform_3, window_bounds = array<i64: 128, 1>}, {transform_indices = @transform_4, window_bounds = array<i64: 128, 128>}, {transform_indices = @transform_5, window_bounds = array<i64: 128, 128>}]} {
    %c0_i32 = arith.constant 0 : i32
    %0 = arith.cmpi eq, %arg1, %c0_i32 : i32
    %1 = arith.extui %0 : i1 to i32
    %c0_i32_0 = arith.constant 0 : i32
    %2 = arith.cmpi ne, %1, %c0_i32_0 : i32
    scf.if %2 {
      %cst_9 = arith.constant 0.000000e+00 : f32
      %17 = vector.broadcast %cst_9 : f32 to vector<128x128xf32>
      %c0_10 = arith.constant 0 : index
      %c0_11 = arith.constant 0 : index
      %18 = vector.load %arg8[%c0_10, %c0_11] : memref<128x128xf32, #tpu.memory_space<vmem>>, vector<128x128xf32>
      tpu.vector_store %arg8[%c0_10, %c0_11], %17 {strides = array<i32>} : memref<128x128xf32, #tpu.memory_space<vmem>>, vector<128x128xf32>,
    } else {
    }
    %c128_i32 = arith.constant 128 : i32
    %3 = arith.muli %arg1, %c128_i32 : i32
    %4 = tpu.assume_multiple %3, 128 : i32
    %5 = arith.index_cast %4 : i32 to index
    %c0 = arith.constant 0 : index
    %6 = vector.load %arg4[%5, %c0] : memref<128x128xbf16, #tpu.memory_space<vmem>>, vector<128x128xbf16>
    %c0_1 = arith.constant 0 : index
    %c0_2 = arith.constant 0 : index
    %7 = vector.load %arg3[%c0_1, %c0_2] : memref<128x128xi8, #tpu.memory_space<vmem>>, vector<128x128xi8>
    %8 = arith.sitofp %7 : vector<128x128xi8> to vector<128x128xf32>
    %9 = arith.truncf %8 : vector<128x128xf32> to vector<128x128xbf16>
    %cst = arith.constant dense<0.000000e+00> : vector<128x128xf32>
    %10 = tpu.matmul %9, %6, %cst {dimension_numbers = #tpu.dot_dimension_numbers<[1], [0], [0], [1], [0, 0, 1, 1], [], []>} : vector<128x128xbf16>, vector<128x128xbf16>, vector<128x128xf32> -> vector<128x128xf32>
    %c0_3 = arith.constant 0 : index
    %c0_4 = arith.constant 0 : index
    %11 = vector.load %arg8[%c0_3, %c0_4] : memref<128x128xf32, #tpu.memory_space<vmem>>, vector<128x128xf32>
    %12 = arith.addf %11, %10 : vector<128x128xf32>
    %c0_5 = arith.constant 0 : index
    %c0_6 = arith.constant 0 : index
    %13 = vector.load %arg8[%c0_5, %c0_6] : memref<128x128xf32, #tpu.memory_space<vmem>>, vector<128x128xf32>
    tpu.vector_store %arg8[%c0_5, %c0_6], %12 {strides = array<i32>} : memref<128x128xf32, #tpu.memory_space<vmem>>, vector<128x128xf32>,
    %c0_i32_7 = arith.constant 0 : i32
    %14 = arith.cmpi eq, %arg1, %c0_i32_7 : i32
    %15 = arith.extui %14 : i1 to i32
    %c0_i32_8 = arith.constant 0 : i32
    %16 = arith.cmpi ne, %15, %c0_i32_8 : i32
    scf.if %16 {
      %c0_9 = arith.constant 0 : index
      %c0_10 = arith.constant 0 : index
      %17 = vector.load %arg5[%c0_9, %c0_10] : memref<128x1xf32, #tpu.memory_space<vmem>>, vector<128x1xf32>
      %c0_11 = arith.constant 0 : index
      %c0_12 = arith.constant 0 : index
      %18 = vector.load %arg8[%c0_11, %c0_12] : memref<128x128xf32, #tpu.memory_space<vmem>>, vector<128x128xf32>
      %19 = vector.broadcast %17 : vector<128x1xf32> to vector<128x128xf32>
      %20 = arith.mulf %18, %19 : vector<128x128xf32>
      %c0_13 = arith.constant 0 : index
      %c0_14 = arith.constant 0 : index
      %21 = vector.load %arg6[%c0_13, %c0_14] : memref<128x128xf32, #tpu.memory_space<vmem>>, vector<128x128xf32>
      %22 = arith.addf %21, %20 : vector<128x128xf32>
      %c0_15 = arith.constant 0 : index
      %23 = memref.load %arg2[%c0_15] : memref<1xf32, #tpu.memory_space<smem>>
      %24 = vector.broadcast %23 : f32 to vector<128x128xf32>
      %25 = arith.mulf %22, %24 : vector<128x128xf32>
      %c0_16 = arith.constant 0 : index
      %c0_17 = arith.constant 0 : index
      %26 = vector.load %arg7[%c0_16, %c0_17] : memref<128x128xf32, #tpu.memory_space<vmem>>, vector<128x128xf32>
      tpu.vector_store %arg7[%c0_16, %c0_17], %25 {strides = array<i32>} : memref<128x128xf32, #tpu.memory_space<vmem>>, vector<128x128xf32>,
    } else {
    }
    return
  }
  func.func @transform_0(%arg0: i32, %arg1: i32) -> i32 {
    %c0_i32 = arith.constant 0 : i32
    %c0_i32_0 = arith.constant 0 : i32
    return %c0_i32 : i32
  }
  func.func @transform_1(%arg0: i32, %arg1: i32) -> (i32, i32) {
    %c0_i32 = arith.constant 0 : i32
    return %arg0, %arg1 : i32, i32
  }
  func.func @transform_2(%arg0: i32, %arg1: i32) -> (i32, i32) {
    %c0_i32 = arith.constant 0 : i32
    %c0_i32_0 = arith.constant 0 : i32
    %c0_i32_1 = arith.constant 0 : i32
    return %c0_i32, %c0_i32_0 : i32, i32
  }
  func.func @transform_3(%arg0: i32, %arg1: i32) -> (i32, i32) {
    %c0_i32 = arith.constant 0 : i32
    %c0_i32_0 = arith.constant 0 : i32
    return %arg0, %c0_i32 : i32, i32
  }
  func.func @transform_4(%arg0: i32, %arg1: i32) -> (i32, i32) {
    %c0_i32 = arith.constant 0 : i32
    %c0_i32_0 = arith.constant 0 : i32
    return %arg0, %c0_i32 : i32, i32
  }
  func.func @transform_5(%arg0: i32, %arg1: i32) -> (i32, i32) {
    %c0_i32 = arith.constant 0 : i32
    %c0_i32_0 = arith.constant 0 : i32
    return %arg0, %c0_i32 : i32, i32
  }
}

module attributes {stable_mosaic.version = 11 : i64} {
  func.func @_prop_kernel(%arg0: i32, %arg1: i32, %arg2: memref<1xf32, #tpu.memory_space<smem>>, %arg3: memref<128x128xi8, #tpu.memory_space<vmem>>, %arg4: memref<128x128xbf16, #tpu.memory_space<vmem>>, %arg5: memref<128x1xf32, #tpu.memory_space<vmem>>, %arg6: memref<128x128xf32, #tpu.memory_space<vmem>>, %arg7: memref<128x128xf32, #tpu.memory_space<vmem>>, %arg8: memref<128x128xf32, #tpu.memory_space<vmem>>) attributes {dimension_semantics = [#tpu.dimension_semantics<parallel>, #tpu.dimension_semantics<arbitrary>], iteration_bounds = array<i64: 1, 1>, scalar_prefetch = 0 : i64, scratch_operands = 1 : i64, tpu.core_type = #tpu.core_type<tc>, window_params = [{transform_indices = @transform_0, window_bounds = array<i64: 1>}, {transform_indices = @transform_1, window_bounds = array<i64: 128, 128>}, {pipeline_mode = #tpu.pipeline_mode<synchronous>, transform_indices = @transform_2, window_bounds = array<i64: 128, 128>}, {transform_indices = @transform_3, window_bounds = array<i64: 128, 1>}, {transform_indices = @transform_4, window_bounds = array<i64: 128, 128>}, {transform_indices = @transform_5, window_bounds = array<i64: 128, 128>}]} {
    %c0_i32 = arith.constant 0 : i32
    %0 = arith.cmpi eq, %arg1, %c0_i32 : i32
    %1 = arith.extui %0 : i1 to i32
    %c0_i32_0 = arith.constant 0 : i32
    %2 = arith.cmpi ne, %1, %c0_i32_0 : i32
    scf.if %2 {
      %cst_9 = arith.constant 0.000000e+00 : f32
      %17 = vector.broadcast %cst_9 : f32 to vector<128x128xf32>
      %c0_10 = arith.constant 0 : index
      %c0_11 = arith.constant 0 : index
      %18 = vector.load %arg8[%c0_10, %c0_11] : memref<128x128xf32, #tpu.memory_space<vmem>>, vector<128x128xf32>
      tpu.vector_store %arg8[%c0_10, %c0_11], %17 {strides = array<i32>} : memref<128x128xf32, #tpu.memory_space<vmem>>, vector<128x128xf32>,
    } else {
    }
    %c128_i32 = arith.constant 128 : i32
    %3 = arith.muli %arg1, %c128_i32 : i32
    %4 = tpu.assume_multiple %3, 128 : i32
    %5 = arith.index_cast %4 : i32 to index
    %c0 = arith.constant 0 : index
    %6 = vector.load %arg4[%5, %c0] : memref<128x128xbf16, #tpu.memory_space<vmem>>, vector<128x128xbf16>
    %c0_1 = arith.constant 0 : index
    %c0_2 = arith.constant 0 : index
    %7 = vector.load %arg3[%c0_1, %c0_2] : memref<128x128xi8, #tpu.memory_space<vmem>>, vector<128x128xi8>
    %8 = arith.sitofp %7 : vector<128x128xi8> to vector<128x128xf32>
    %9 = arith.truncf %8 : vector<128x128xf32> to vector<128x128xbf16>
    %cst = arith.constant dense<0.000000e+00> : vector<128x128xf32>
    %10 = tpu.matmul %9, %6, %cst {dimension_numbers = #tpu.dot_dimension_numbers<[0], [0], [1], [1], [0, 1, 1, 1], [], []>} : vector<128x128xbf16>, vector<128x128xbf16>, vector<128x128xf32> -> vector<128x128xf32>
    %c0_3 = arith.constant 0 : index
    %c0_4 = arith.constant 0 : index
    %11 = vector.load %arg8[%c0_3, %c0_4] : memref<128x128xf32, #tpu.memory_space<vmem>>, vector<128x128xf32>
    %12 = arith.addf %11, %10 : vector<128x128xf32>
    %c0_5 = arith.constant 0 : index
    %c0_6 = arith.constant 0 : index
    %13 = vector.load %arg8[%c0_5, %c0_6] : memref<128x128xf32, #tpu.memory_space<vmem>>, vector<128x128xf32>
    tpu.vector_store %arg8[%c0_5, %c0_6], %12 {strides = array<i32>} : memref<128x128xf32, #tpu.memory_space<vmem>>, vector<128x128xf32>,
    %c0_i32_7 = arith.constant 0 : i32
    %14 = arith.cmpi eq, %arg1, %c0_i32_7 : i32
    %15 = arith.extui %14 : i1 to i32
    %c0_i32_8 = arith.constant 0 : i32
    %16 = arith.cmpi ne, %15, %c0_i32_8 : i32
    scf.if %16 {
      %c0_9 = arith.constant 0 : index
      %c0_10 = arith.constant 0 : index
      %17 = vector.load %arg5[%c0_9, %c0_10] : memref<128x1xf32, #tpu.memory_space<vmem>>, vector<128x1xf32>
      %c0_11 = arith.constant 0 : index
      %c0_12 = arith.constant 0 : index
      %18 = vector.load %arg8[%c0_11, %c0_12] : memref<128x128xf32, #tpu.memory_space<vmem>>, vector<128x128xf32>
      %19 = vector.broadcast %17 : vector<128x1xf32> to vector<128x128xf32>
      %20 = arith.mulf %18, %19 : vector<128x128xf32>
      %c0_13 = arith.constant 0 : index
      %c0_14 = arith.constant 0 : index
      %21 = vector.load %arg6[%c0_13, %c0_14] : memref<128x128xf32, #tpu.memory_space<vmem>>, vector<128x128xf32>
      %22 = arith.addf %21, %20 : vector<128x128xf32>
      %c0_15 = arith.constant 0 : index
      %23 = memref.load %arg2[%c0_15] : memref<1xf32, #tpu.memory_space<smem>>
      %24 = vector.broadcast %23 : f32 to vector<128x128xf32>
      %25 = arith.mulf %22, %24 : vector<128x128xf32>
      %c0_16 = arith.constant 0 : index
      %c0_17 = arith.constant 0 : index
      %26 = vector.load %arg7[%c0_16, %c0_17] : memref<128x128xf32, #tpu.memory_space<vmem>>, vector<128x128xf32>
      tpu.vector_store %arg7[%c0_16, %c0_17], %25 {strides = array<i32>} : memref<128x128xf32, #tpu.memory_space<vmem>>, vector<128x128xf32>,
    } else {
    }
    return
  }
  func.func @transform_0(%arg0: i32, %arg1: i32) -> i32 {
    %c0_i32 = arith.constant 0 : i32
    %c0_i32_0 = arith.constant 0 : i32
    return %c0_i32 : i32
  }
  func.func @transform_1(%arg0: i32, %arg1: i32) -> (i32, i32) {
    %c0_i32 = arith.constant 0 : i32
    return %arg1, %arg0 : i32, i32
  }
  func.func @transform_2(%arg0: i32, %arg1: i32) -> (i32, i32) {
    %c0_i32 = arith.constant 0 : i32
    %c0_i32_0 = arith.constant 0 : i32
    %c0_i32_1 = arith.constant 0 : i32
    return %c0_i32, %c0_i32_0 : i32, i32
  }
  func.func @transform_3(%arg0: i32, %arg1: i32) -> (i32, i32) {
    %c0_i32 = arith.constant 0 : i32
    %c0_i32_0 = arith.constant 0 : i32
    return %arg0, %c0_i32 : i32, i32
  }
  func.func @transform_4(%arg0: i32, %arg1: i32) -> (i32, i32) {
    %c0_i32 = arith.constant 0 : i32
    %c0_i32_0 = arith.constant 0 : i32
    return %arg0, %c0_i32 : i32, i32
  }
  func.func @transform_5(%arg0: i32, %arg1: i32) -> (i32, i32) {
    %c0_i32 = arith.constant 0 : i32
    %c0_i32_0 = arith.constant 0 : i32
    return %arg0, %c0_i32 : i32, i32
  }
}

</mosaic_0001>

<bundles_post_ra>
// kernel: _lightgcn_propagate.6
= control target key start
LH: loop header
LB: loop body
LE: loop exit
PB: predicated region body
PF: predicated region fallthrough
CT: control target
= control target key end

     0   :  { %v735_v1 = vmov 0   ;;  %s1032_s2 = inlined_call_operand.vmem [shape: bf16[128,128], index: 2, kind: input, shape index: {}]   ;;  %s1033_s1 = inlined_call_operand.vmem [shape: s8[128,128], index: 1, kind: input, shape index: {}]   ;;  %s1034_s3 = inlined_call_operand.vmem [shape: f32[128,1], index: 3, kind: input, shape index: {}]   ;;  %s1035_s4 = inlined_call_operand.vmem [shape: f32[128,128], index: 4, kind: input, shape index: {}, may-alias: {4,6}]   ;;  %s1036_s0 = inlined_call_operand.<no memory space> [shape: f32[1], index: 0, kind: input, shape index: {}]   ;;  %s1037_s6 = inlined_call_operand.vmem [shape: f32[128,128], index: 6, kind: output, shape index: {1}, may-alias: {4,6}]   ;;  %s1038_s5 = inlined_call_operand.vmem [shape: bf16[128,128], index: 5, kind: output, shape index: {0}]  }
   0x1   :  { %v727_v0 = vld [vmem:[%s1032_s2] sm:$0xff]   ;;  %726 = vset.pattern.permute.xlu1 %v735_v1  ;;  %725 = vset.pattern.permute.xlu0 %v735_v1  ;;  %v728_v2 = vld [vmem:[%s1032_s2 + $0x8] sm:$0xff]   ;;  %v729_v3 = vld [vmem:[%s1032_s2 + $0x10] sm:$0xff]   ;;  %v890_v61 = vstv %s1036_s0 }
   0x2   :  { %676 = vmatprep.subr.bf16.mxu0 %v727_v0  ;;  %708 = vmatprep.subr.bf16.mxu1 %v727_v0  ;;  %v730_v4 = vld [vmem:[%s1032_s2 + $0x18] sm:$0xff]   ;;  %v786_v5 = vld [vmem:[%s1033_s1] sm:$0xff]  ;;  %v791_v6 = vld [vmem:[%s1033_s1 + $0x10] sm:$0xff] }
   0x3   :  { %677 = vmatpush3.bf16.msra.mxu0 %v727_v0  ;;  %716 = vmatpush3.bf16.msra.mxu1 %v727_v0  ;;  %v69_v7 = vunpack.c.l.s8.bf16 %v786_v5  ;;  %v73_v8 = vunpack.c.l.s8.bf16 %v791_v6  ;;  %v275_v9 = vld [vmem:[%s1034_s3 + $0x10] sm:$0xff]  ;;  %v273_v10 = vld [vmem:[%s1034_s3] sm:$0xff]  ;;  %v276_v11 = vld [vmem:[%s1034_s3 + $0x18] sm:$0xff]  ;;  %v70_v27 = vunpack.c.h.s8.bf16 %v786_v5  ;;  %v74_v28 = vunpack.c.h.s8.bf16 %v791_v6 }
   0x4   :  { %678 = vmatprep.subr.bf16.mxu0 %v728_v2  ;;  %709 = vmatprep.subr.bf16.mxu1 %v728_v2  ;;  %v274_v12 = vld [vmem:[%s1034_s3 + $0x8] sm:$0xff]  ;;  %v731_v13 = vld [vmem:[%s1032_s2 + $0x20] sm:$0xff]   ;;  %v280_v17 = vld [vmem:[%s1034_s3 + $0x38] sm:$0xff] }
   0x5   :  { %317 = vperm.xlu1 %726, %v275_v9   ;;  %307 = vperm.xlu0 %725, %v273_v10   ;;  %v278_v14 = vld [vmem:[%s1034_s3 + $0x28] sm:$0xff]  ;;  %v277_v15 = vld [vmem:[%s1034_s3 + $0x20] sm:$0xff]  ;;  %v279_v18 = vld [vmem:[%s1034_s3 + $0x30] sm:$0xff] }
   0x6   :  { %692 = vmatprep.mubr.bf16.mxu0 %v69_v7  ;;  %700 = vmatprep.mubr.bf16.mxu1 %v73_v8  ;;  %v732_v16 = vld [vmem:[%s1032_s2 + $0x28] sm:$0xff]   ;;  %v733_v19 = vld [vmem:[%s1032_s2 + $0x30] sm:$0xff]   ;;  %v281_v21 = vld [vmem:[%s1034_s3 + $0x40] sm:$0xff] }
   0x7   :  { %679 = vmatpush3.bf16.msra.mxu0 %v728_v2  ;;  %717 = vmatpush3.bf16.msra.mxu1 %v728_v2  ;;  %v282_v20 = vld [vmem:[%s1034_s3 + $0x48] sm:$0xff]  ;;  %v734_v22 = vld [vmem:[%s1032_s2 + $0x38] sm:$0xff]   ;;  %v283_v24 = vld [vmem:[%s1034_s3 + $0x50] sm:$0xff] }
   0x8   :  { %680 = vmatprep.subr.bf16.mxu0 %v729_v3  ;;  %710 = vmatprep.subr.bf16.mxu1 %v729_v3  ;;  %v284_v23 = vld [vmem:[%s1034_s3 + $0x58] sm:$0xff]  ;;  %v66_v25 = vld [vmem:[%s1033_s1 + $0x8] sm:$0xff]  ;;  %v285_v32 = vld [vmem:[%s1034_s3 + $0x60] sm:$0xff] }
   0x9   :  { %322 = vperm.xlu1 %726, %v276_v11   ;;  %312 = vperm.xlu0 %725, %v274_v12   ;;  %v68_v26 = vld [vmem:[%s1033_s1 + $0x18] sm:$0xff]  ;;  %v71_v29 = vunpack.c.l.s8.bf16 %v66_v25  ;;  %v286_v31 = vld [vmem:[%s1034_s3 + $0x68] sm:$0xff]  ;;  %v287_v34 = vld [vmem:[%s1034_s3 + $0x70] sm:$0xff]  ;;  %v72_v35 = vunpack.c.h.s8.bf16 %v66_v25 }
   0xa   :  { %v75_v30 = vunpack.c.l.s8.bf16 %v68_v26  ;;  %v288_v33 = vld [vmem:[%s1034_s3 + $0x78] sm:$0xff]  ;;  %v76_v36 = vunpack.c.h.s8.bf16 %v68_v26  ;;  %v499_v52 = vld [vmem:[%s1035_s4 + $0x10] sm:$0xff]  ;;  %v497_v58 = vld [vmem:[%s1035_s4] sm:$0xff] }
   0xb   :  { %681 = vmatpush3.bf16.msra.mxu0 %v729_v3  ;;  %718 = vmatpush3.bf16.msra.mxu1 %v729_v3  ;;  %v507_v54 = vld [vmem:[%s1035_s4 + $0x50] sm:$0xff]  ;;  %v505_v60 = vld [vmem:[%s1035_s4 + $0x40] sm:$0xff]  ;;  %v500_v12 = vld [vmem:[%s1035_s4 + $0x18] sm:$0xff] }
   0xc   :  { %682 = vmatprep.subr.bf16.mxu0 %v730_v4  ;;  %711 = vmatprep.subr.bf16.mxu1 %v730_v4 }
   0xd   :  { %332 = vperm.xlu1 %726, %v278_v14   ;;  %327 = vperm.xlu0 %725, %v277_v15  }
   0xf   :  { %683 = vmatpush3.bf16.msra.mxu0 %v730_v4  ;;  %719 = vmatpush3.bf16.msra.mxu1 %v730_v4 }
  0x10   :  { %684 = vmatprep.subr.bf16.mxu0 %v731_v13  ;;  %712 = vmatprep.subr.bf16.mxu1 %v731_v13 }
  0x11   :  { %342 = vperm.xlu1 %726, %v280_v17   ;;  %337 = vperm.xlu0 %725, %v279_v18   ;;  %v498_v18 = vld [vmem:[%s1035_s4 + $0x8] sm:$0xff] }
  0x13   :  { %685 = vmatpush3.bf16.msra.mxu0 %v731_v13  ;;  %720 = vmatpush3.bf16.msra.mxu1 %v731_v13  ;;  %v508_v13 = vld [vmem:[%s1035_s4 + $0x58] sm:$0xff] }
  0x14   :  { %686 = vmatprep.subr.bf16.mxu0 %v732_v16  ;;  %713 = vmatprep.subr.bf16.mxu1 %v732_v16 }
  0x15   :  { %352 = vperm.xlu1 %726, %v282_v20   ;;  %347 = vperm.xlu0 %725, %v281_v21  }
  0x17   :  { %687 = vmatpush3.bf16.msra.mxu0 %v732_v16  ;;  %721 = vmatpush3.bf16.msra.mxu1 %v732_v16 }
  0x18   :  { %688 = vmatprep.subr.bf16.mxu0 %v733_v19  ;;  %714 = vmatprep.subr.bf16.mxu1 %v733_v19 }
  0x19   :  { %362 = vperm.xlu1 %726, %v284_v23   ;;  %357 = vperm.xlu0 %725, %v283_v24  }
  0x1b   :  { %689 = vmatpush3.bf16.msra.mxu0 %v733_v19  ;;  %722 = vmatpush3.bf16.msra.mxu1 %v733_v19  ;;  %v506_v19 = vld [vmem:[%s1035_s4 + $0x48] sm:$0xff] }
  0x1c   :  { %690 = vmatprep.subr.bf16.mxu0 %v734_v22  ;;  %715 = vmatprep.subr.bf16.mxu1 %v734_v22 }
  0x1d   :  { %372 = vperm.xlu1 %726, %v286_v31   ;;  %367 = vperm.xlu0 %725, %v285_v32  }
  0x1f   :  { %691 = vmatpush3.bf16.msra.mxu0 %v734_v22  ;;  %723 = vmatpush3.bf16.msra.mxu1 %v734_v22 }
  0x21   :  { %382 = vperm.xlu1 %726, %v288_v33   ;;  %377 = vperm.xlu0 %725, %v287_v34  }
  0x22   :  { %693 = vmatmul.mubr.bf16.vlgmr.msra.gmra.mrb[0].mxu0 %v70_v27  ;;  %701 = vmatmul.mubr.bf16.vlgmr.msra.gmra.mrb[0].mxu1 %v74_v28 }
  0x23   :  { %696 = vmatprep.mubr.bf16.mxu0 %v71_v29  ;;  %704 = vmatprep.mubr.bf16.mxu1 %v75_v30 }
  0x2a   :  { %697 = vmatmul.mubr.bf16.gmra.mrb[4].mxu0 %v72_v35  ;;  %705 = vmatmul.mubr.bf16.gmra.mrb[4].mxu1 %v76_v36 }
  0x84   :  { %v318_v37 = vpop.permute.xlu1 %317  ;;  %v308_v38 = vpop.permute.xlu0 %307 }
  0x88   :  { %v323_v39 = vpop.permute.xlu1 %322  ;;  %v313_v40 = vpop.permute.xlu0 %312 }
  0x8c   :  { %v863_v41 = vpop.permute.xlu1 %332  ;;  %v865_v42 = vpop.permute.xlu0 %327 }
  0x90   :  { %v867_v43 = vpop.permute.xlu1 %342  ;;  %v869_v44 = vpop.permute.xlu0 %337 }
  0x94   :  { %v353_v45 = vpop.permute.xlu1 %352  ;;  %v348_v46 = vpop.permute.xlu0 %347 }
  0x98   :  { %v363_v47 = vpop.permute.xlu1 %362  ;;  %v358_v48 = vpop.permute.xlu0 %357 }
  0x9c   :  { %v871_v49 = vpop.permute.xlu1 %372  ;;  %v873_v50 = vpop.permute.xlu0 %367 }
  0xa0   :  { %v908_v24 = vpop.permute.xlu1 %382  ;;  %v378_v25 = vpop.permute.xlu0 %377 }
  0xf5   :  { %v694_v51 = vpop.f32.mrb[0].mxu0  ;;  %v702_v53 = vpop.f32.mrb[0].mxu1 }
  0xf6   :  { %v387_v55 = vmul.f32 %v694_v51, %v318_v37  ;;  %v395_v56 = vmul.f32 %v702_v53, %v358_v48  ;;  %v159_v57 = vpop.f32.mrb[1].mxu0  ;;  %v191_v59 = vpop.f32.mrb[1].mxu1 }
  0xf7   :  { %v385_v62 = vmul.f32 %v308_v38, %v159_v57  ;;  %v393_v63 = vmul.f32 %v348_v46, %v191_v59  ;;  %v695_v0 = vpop.f32.mrb[2].mxu0  ;;  %v703_v1 = vpop.f32.mrb[2].mxu1 }
  0xf8   :  { %v403_v2 = vmul.f32 %v387_v55, %v318_v37  ;;  %v515_v3 = vadd.f32 %v499_v52, %v387_v55  ;;  %v411_v4 = vmul.f32 %v395_v56, %v358_v48  ;;  %v523_v5 = vadd.f32 %v507_v54, %v395_v56  ;;  %v162_v6 = vpop.f32.mrb[3].mxu0  ;;  %v194_v7 = vpop.f32.mrb[3].mxu1 }
  0xf9   :  { %v401_v8 = vmul.f32 %v385_v62, %v308_v38  ;;  %v513_v9 = vadd.f32 %v497_v58, %v385_v62  ;;  %v409_v10 = vmul.f32 %v393_v63, %v348_v46  ;;  %v521_v11 = vadd.f32 %v505_v60, %v393_v63 }
  0xfa   :  { %v533_v14 = vmul.f32 %v890_v61, %v515_v3  ;;  %v541_v15 = vmul.f32 %v890_v61, %v523_v5  ;;  %v388_v16 = vmul.f32 %v695_v0, %v323_v39  ;;  %v396_v17 = vmul.f32 %v703_v1, %v363_v47 }
  0xfb   :  { %v531_v20 = vmul.f32 %v890_v61, %v513_v9  ;;  %v539_v21 = vmul.f32 %v890_v61, %v521_v11  ;;  %v386_v22 = vmul.f32 %v313_v40, %v162_v6  ;;  %v394_v23 = vmul.f32 %v353_v45, %v194_v7 }
  0xfc   :  { %549 = vst [vmem:[%s1037_s6 + $0x10] sm:$0xff] %v533_v14  ;;  %557 = vst [vmem:[%s1037_s6 + $0x50] sm:$0xff] %v541_v15  ;;  %v404_v26 = vmul.f32 %v388_v16, %v323_v39  ;;  %v516_v27 = vadd.f32 %v500_v12, %v388_v16  ;;  %v412_v28 = vmul.f32 %v396_v17, %v363_v47 }
  0xfd   :  { %v524_v29 = vadd.f32 %v508_v13, %v396_v17  ;;  %547 = vst [vmem:[%s1037_s6] sm:$0xff] %v531_v20  ;;  %555 = vst [vmem:[%s1037_s6 + $0x40] sm:$0xff] %v539_v21  ;;  %v402_v30 = vmul.f32 %v386_v22, %v313_v40  ;;  %v514_v31 = vadd.f32 %v498_v18, %v386_v22  ;;  %v698_v34 = vpop.f32.mrb[4].mxu0  ;;  %v706_v35 = vpop.f32.mrb[4].mxu1 }
  0xfe   :  { %v410_v32 = vmul.f32 %v394_v23, %v353_v45  ;;  %v522_v33 = vadd.f32 %v506_v19, %v394_v23  ;;  %v621_v36 = vpack.c.bf16 %v404_v26, %v403_v2  ;;  %v534_v37 = vmul.f32 %v890_v61, %v516_v27  ;;  %v175_v46 = vpop.f32.mrb[5].mxu0  ;;  %v207_v47 = vpop.f32.mrb[5].mxu1 }
  0xff   :  { %v641_v38 = vpack.c.bf16 %v412_v28, %v411_v4  ;;  %v542_v39 = vmul.f32 %v890_v61, %v524_v29  ;;  %v616_v48 = vpack.c.bf16 %v402_v30, %v401_v8  ;;  %v532_v51 = vmul.f32 %v890_v61, %v514_v31  ;;  %v699_v54 = vpop.f32.mrb[6].mxu0  ;;  %v707_v55 = vpop.f32.mrb[6].mxu1 }
 0x100   :  { %v636_v52 = vpack.c.bf16 %v410_v32, %v409_v10  ;;  %v540_v53 = vmul.f32 %v890_v61, %v522_v33  ;;  %653 = vst [vmem:[%s1038_s5 + $0x8] sm:$0xff] %v621_v36   ;;  %v391_v56 = vmul.f32 %v698_v34, %v869_v44  ;;  %v399_v57 = vmul.f32 %v706_v35, %v378_v25  ;;  %v178_v63 = vpop.f32.mrb[7].mxu0  ;;  %v210_v0 = vpop.f32.mrb[7].mxu1 }
 0x101   :  { %657 = vst [vmem:[%s1038_s5 + $0x28] sm:$0xff] %v641_v38   ;;  %v389_v58 = vmul.f32 %v865_v42, %v175_v46  ;;  %v397_v60 = vmul.f32 %v873_v50, %v207_v47  ;;  %617 = vst [vmem:[%s1038_s5] sm:$0xff] %v616_v48   ;;  %v392_v1 = vmul.f32 %v699_v54, %v867_v43 }
 0x102   :  { %656 = vst [vmem:[%s1038_s5 + $0x20] sm:$0xff] %v636_v52   ;;  %v400_v3 = vmul.f32 %v707_v55, %v908_v24  ;;  %v390_v4 = vmul.f32 %v863_v41, %v178_v63  ;;  %v398_v5 = vmul.f32 %v871_v49, %v210_v0  ;;  %v407_v6 = vmul.f32 %v391_v56, %v869_v44 }
 0x103   :  { %v415_v8 = vmul.f32 %v399_v57, %v378_v25  ;;  %v405_v11 = vmul.f32 %v389_v58, %v865_v42  ;;  %v413_v13 = vmul.f32 %v397_v60, %v873_v50  ;;  %v408_v17 = vmul.f32 %v392_v1, %v867_v43 }
 0x104   :  { %v503_v40 = vld [vmem:[%s1035_s4 + $0x30] sm:$0xff]  ;;  %v416_v20 = vmul.f32 %v400_v3, %v908_v24  ;;  %v406_v23 = vmul.f32 %v390_v4, %v863_v41  ;;  %v414_v27 = vmul.f32 %v398_v5, %v871_v49 }
 0x105   :  { %v511_v45 = vld [vmem:[%s1035_s4 + $0x70] sm:$0xff]  ;;  %v519_v7 = vadd.f32 %v503_v40, %v391_v56  ;;  %v631_v43 = vpack.c.bf16 %v408_v17, %v407_v6 }
 0x106   :  { %550 = vst [vmem:[%s1037_s6 + $0x18] sm:$0xff] %v534_v37  ;;  %558 = vst [vmem:[%s1037_s6 + $0x58] sm:$0xff] %v542_v39  ;;  %v527_v9 = vadd.f32 %v511_v45, %v399_v57  ;;  %v651_v24 = vpack.c.bf16 %v416_v20, %v415_v8  ;;  %v626_v41 = vpack.c.bf16 %v406_v23, %v405_v11 }
 0x107   :  { %v537_v16 = vmul.f32 %v890_v61, %v519_v7  ;;  %655 = vst [vmem:[%s1038_s5 + $0x18] sm:$0xff] %v631_v43   ;;  %v646_v49 = vpack.c.bf16 %v414_v27, %v413_v13 }
 0x108   :  { %v545_v44 = vmul.f32 %v890_v61, %v527_v9  ;;  %659 = vst [vmem:[%s1038_s5 + $0x38] sm:$0xff] %v651_v24   ;;  %654 = vst [vmem:[%s1038_s5 + $0x10] sm:$0xff] %v626_v41  }
 0x109   :  { %658 = vst [vmem:[%s1038_s5 + $0x30] sm:$0xff] %v646_v49  }
 0x10d   :  { %v501_v59 = vld [vmem:[%s1035_s4 + $0x20] sm:$0xff] }
 0x10e   :  { %v509_v62 = vld [vmem:[%s1035_s4 + $0x60] sm:$0xff]  ;;  %v517_v12 = vadd.f32 %v501_v59, %v389_v58 }
 0x10f   :  { %548 = vst [vmem:[%s1037_s6 + $0x8] sm:$0xff] %v532_v51  ;;  %556 = vst [vmem:[%s1037_s6 + $0x48] sm:$0xff] %v540_v53  ;;  %v525_v14 = vadd.f32 %v509_v62, %v397_v60 }
 0x110   :  { %v535_v42 = vmul.f32 %v890_v61, %v517_v12 }
 0x111   :  { %v543_v50 = vmul.f32 %v890_v61, %v525_v14 }
 0x116   :  { %v504_v2 = vld [vmem:[%s1035_s4 + $0x38] sm:$0xff]  ;;  %v502_v15 = vld [vmem:[%s1035_s4 + $0x28] sm:$0xff] }
 0x117   :  { %v512_v10 = vld [vmem:[%s1035_s4 + $0x78] sm:$0xff]  ;;  %v520_v18 = vadd.f32 %v504_v2, %v392_v1  ;;  %v510_v19 = vld [vmem:[%s1035_s4 + $0x68] sm:$0xff]  ;;  %v518_v25 = vadd.f32 %v502_v15, %v390_v4 }
 0x118   :  { %v528_v21 = vadd.f32 %v512_v10, %v400_v3  ;;  %553 = vst [vmem:[%s1037_s6 + $0x30] sm:$0xff] %v537_v16  ;;  %561 = vst [vmem:[%s1037_s6 + $0x70] sm:$0xff] %v545_v44  ;;  %v526_v28 = vadd.f32 %v510_v19, %v398_v5 }
 0x119   :  { %v538_v22 = vmul.f32 %v890_v61, %v520_v18  ;;  %551 = vst [vmem:[%s1037_s6 + $0x20] sm:$0xff] %v535_v42  ;;  %559 = vst [vmem:[%s1037_s6 + $0x60] sm:$0xff] %v543_v50  ;;  %v536_v29 = vmul.f32 %v890_v61, %v518_v25 }
 0x11a   :  { %v546_v26 = vmul.f32 %v890_v61, %v528_v21  ;;  %v544_v30 = vmul.f32 %v890_v61, %v526_v28 }
 0x11b   :  { %554 = vst [vmem:[%s1037_s6 + $0x38] sm:$0xff] %v538_v22  ;;  %552 = vst [vmem:[%s1037_s6 + $0x28] sm:$0xff] %v536_v29 }
 0x11c   :  { %562 = vst [vmem:[%s1037_s6 + $0x78] sm:$0xff] %v546_v26  ;;  %560 = vst [vmem:[%s1037_s6 + $0x68] sm:$0xff] %v544_v30 }

// kernel: _lightgcn_propagate.10
= control target key start
LH: loop header
LB: loop body
LE: loop exit
PB: predicated region body
PF: predicated region fallthrough
CT: control target
= control target key end

     0   :  { %v554_v1 = vmov 0   ;;  %s812_s2 = inlined_call_operand.vmem [shape: bf16[128,128], index: 2, kind: input, shape index: {}]   ;;  %s813_s1 = inlined_call_operand.vmem [shape: s8[128,128], index: 1, kind: input, shape index: {}]   ;;  %s814_s3 = inlined_call_operand.vmem [shape: f32[128,1], index: 3, kind: input, shape index: {}]   ;;  %s815_s4 = inlined_call_operand.vmem [shape: f32[128,128], index: 4, kind: input, shape index: {}, may-alias: {4,5}]   ;;  %s816_s0 = inlined_call_operand.<no memory space> [shape: f32[1], index: 0, kind: input, shape index: {}]   ;;  %s817_s5 = inlined_call_operand.vmem [shape: f32[128,128], index: 5, kind: output, shape index: {}, may-alias: {4,5}]  }
   0x1   :  { %v546_v0 = vld [vmem:[%s812_s2] sm:$0xff]   ;;  %545 = vset.pattern.permute.xlu1 %v554_v1  ;;  %544 = vset.pattern.permute.xlu0 %v554_v1  ;;  %v547_v2 = vld [vmem:[%s812_s2 + $0x8] sm:$0xff]   ;;  %v548_v3 = vld [vmem:[%s812_s2 + $0x10] sm:$0xff]   ;;  %v704_v61 = vstv %s816_s0 }
   0x2   :  { %495 = vmatprep.subr.bf16.mxu0 %v546_v0  ;;  %527 = vmatprep.subr.bf16.mxu1 %v546_v0  ;;  %v549_v4 = vld [vmem:[%s812_s2 + $0x18] sm:$0xff]   ;;  %v600_v5 = vld [vmem:[%s813_s1] sm:$0xff]  ;;  %v605_v6 = vld [vmem:[%s813_s1 + $0x10] sm:$0xff] }
   0x3   :  { %496 = vmatpush3.bf16.msra.mxu0 %v546_v0  ;;  %535 = vmatpush3.bf16.msra.mxu1 %v546_v0  ;;  %v67_v7 = vunpack.c.l.s8.bf16 %v600_v5  ;;  %v71_v8 = vunpack.c.l.s8.bf16 %v605_v6  ;;  %v273_v9 = vld [vmem:[%s814_s3 + $0x10] sm:$0xff]  ;;  %v271_v10 = vld [vmem:[%s814_s3] sm:$0xff]  ;;  %v274_v11 = vld [vmem:[%s814_s3 + $0x18] sm:$0xff]  ;;  %v68_v27 = vunpack.c.h.s8.bf16 %v600_v5  ;;  %v72_v28 = vunpack.c.h.s8.bf16 %v605_v6 }
   0x4   :  { %497 = vmatprep.subr.bf16.mxu0 %v547_v2  ;;  %528 = vmatprep.subr.bf16.mxu1 %v547_v2  ;;  %v272_v12 = vld [vmem:[%s814_s3 + $0x8] sm:$0xff]  ;;  %v550_v13 = vld [vmem:[%s812_s2 + $0x20] sm:$0xff]   ;;  %v278_v17 = vld [vmem:[%s814_s3 + $0x38] sm:$0xff] }
   0x5   :  { %315 = vperm.xlu1 %545, %v273_v9   ;;  %305 = vperm.xlu0 %544, %v271_v10   ;;  %v276_v14 = vld [vmem:[%s814_s3 + $0x28] sm:$0xff]  ;;  %v275_v15 = vld [vmem:[%s814_s3 + $0x20] sm:$0xff]  ;;  %v277_v18 = vld [vmem:[%s814_s3 + $0x30] sm:$0xff] }
   0x6   :  { %511 = vmatprep.mubr.bf16.mxu0 %v67_v7  ;;  %519 = vmatprep.mubr.bf16.mxu1 %v71_v8  ;;  %v551_v16 = vld [vmem:[%s812_s2 + $0x28] sm:$0xff]   ;;  %v552_v19 = vld [vmem:[%s812_s2 + $0x30] sm:$0xff]   ;;  %v279_v21 = vld [vmem:[%s814_s3 + $0x40] sm:$0xff] }
   0x7   :  { %498 = vmatpush3.bf16.msra.mxu0 %v547_v2  ;;  %536 = vmatpush3.bf16.msra.mxu1 %v547_v2  ;;  %v280_v20 = vld [vmem:[%s814_s3 + $0x48] sm:$0xff]  ;;  %v553_v22 = vld [vmem:[%s812_s2 + $0x38] sm:$0xff]   ;;  %v281_v24 = vld [vmem:[%s814_s3 + $0x50] sm:$0xff] }
   0x8   :  { %499 = vmatprep.subr.bf16.mxu0 %v548_v3  ;;  %529 = vmatprep.subr.bf16.mxu1 %v548_v3  ;;  %v282_v23 = vld [vmem:[%s814_s3 + $0x58] sm:$0xff]  ;;  %v64_v25 = vld [vmem:[%s813_s1 + $0x8] sm:$0xff]  ;;  %v283_v32 = vld [vmem:[%s814_s3 + $0x60] sm:$0xff] }
   0x9   :  { %320 = vperm.xlu1 %545, %v274_v11   ;;  %310 = vperm.xlu0 %544, %v272_v12   ;;  %v66_v26 = vld [vmem:[%s813_s1 + $0x18] sm:$0xff]  ;;  %v69_v29 = vunpack.c.l.s8.bf16 %v64_v25  ;;  %v284_v31 = vld [vmem:[%s814_s3 + $0x68] sm:$0xff]  ;;  %v285_v34 = vld [vmem:[%s814_s3 + $0x70] sm:$0xff]  ;;  %v70_v35 = vunpack.c.h.s8.bf16 %v64_v25 }
   0xa   :  { %v73_v30 = vunpack.c.l.s8.bf16 %v66_v26  ;;  %v286_v33 = vld [vmem:[%s814_s3 + $0x78] sm:$0xff]  ;;  %v74_v36 = vunpack.c.h.s8.bf16 %v66_v26  ;;  %v401_v52 = vld [vmem:[%s815_s4 + $0x10] sm:$0xff]  ;;  %v399_v58 = vld [vmem:[%s815_s4] sm:$0xff] }
   0xb   :  { %500 = vmatpush3.bf16.msra.mxu0 %v548_v3  ;;  %537 = vmatpush3.bf16.msra.mxu1 %v548_v3  ;;  %v409_v54 = vld [vmem:[%s815_s4 + $0x50] sm:$0xff]  ;;  %v407_v60 = vld [vmem:[%s815_s4 + $0x40] sm:$0xff]  ;;  %v402_v1 = vld [vmem:[%s815_s4 + $0x18] sm:$0xff] }
   0xc   :  { %501 = vmatprep.subr.bf16.mxu0 %v549_v4  ;;  %530 = vmatprep.subr.bf16.mxu1 %v549_v4  ;;  %v410_v3 = vld [vmem:[%s815_s4 + $0x58] sm:$0xff]  ;;  %v400_v9 = vld [vmem:[%s815_s4 + $0x8] sm:$0xff] }
   0xd   :  { %330 = vperm.xlu1 %545, %v276_v14   ;;  %325 = vperm.xlu0 %544, %v275_v15   ;;  %v408_v11 = vld [vmem:[%s815_s4 + $0x48] sm:$0xff] }
   0xf   :  { %502 = vmatpush3.bf16.msra.mxu0 %v549_v4  ;;  %538 = vmatpush3.bf16.msra.mxu1 %v549_v4 }
  0x10   :  { %503 = vmatprep.subr.bf16.mxu0 %v550_v13  ;;  %531 = vmatprep.subr.bf16.mxu1 %v550_v13 }
  0x11   :  { %340 = vperm.xlu1 %545, %v278_v17   ;;  %335 = vperm.xlu0 %544, %v277_v18  }
  0x13   :  { %504 = vmatpush3.bf16.msra.mxu0 %v550_v13  ;;  %539 = vmatpush3.bf16.msra.mxu1 %v550_v13 }
  0x14   :  { %505 = vmatprep.subr.bf16.mxu0 %v551_v16  ;;  %532 = vmatprep.subr.bf16.mxu1 %v551_v16 }
  0x15   :  { %350 = vperm.xlu1 %545, %v280_v20   ;;  %345 = vperm.xlu0 %544, %v279_v21  }
  0x17   :  { %506 = vmatpush3.bf16.msra.mxu0 %v551_v16  ;;  %540 = vmatpush3.bf16.msra.mxu1 %v551_v16 }
  0x18   :  { %507 = vmatprep.subr.bf16.mxu0 %v552_v19  ;;  %533 = vmatprep.subr.bf16.mxu1 %v552_v19 }
  0x19   :  { %360 = vperm.xlu1 %545, %v282_v23   ;;  %355 = vperm.xlu0 %544, %v281_v24  }
  0x1b   :  { %508 = vmatpush3.bf16.msra.mxu0 %v552_v19  ;;  %541 = vmatpush3.bf16.msra.mxu1 %v552_v19 }
  0x1c   :  { %509 = vmatprep.subr.bf16.mxu0 %v553_v22  ;;  %534 = vmatprep.subr.bf16.mxu1 %v553_v22 }
  0x1d   :  { %370 = vperm.xlu1 %545, %v284_v31   ;;  %365 = vperm.xlu0 %544, %v283_v32  }
  0x1f   :  { %510 = vmatpush3.bf16.msra.mxu0 %v553_v22  ;;  %542 = vmatpush3.bf16.msra.mxu1 %v553_v22 }
  0x21   :  { %380 = vperm.xlu1 %545, %v286_v33   ;;  %375 = vperm.xlu0 %544, %v285_v34  }
  0x22   :  { %512 = vmatmul.mubr.bf16.vlgmr.msra.gmra.mrb[0].mxu0 %v68_v27  ;;  %520 = vmatmul.mubr.bf16.vlgmr.msra.gmra.mrb[0].mxu1 %v72_v28 }
  0x23   :  { %515 = vmatprep.mubr.bf16.mxu0 %v69_v29  ;;  %523 = vmatprep.mubr.bf16.mxu1 %v73_v30 }
  0x2a   :  { %516 = vmatmul.mubr.bf16.gmra.mrb[4].mxu0 %v70_v35  ;;  %524 = vmatmul.mubr.bf16.gmra.mrb[4].mxu1 %v74_v36 }
  0x84   :  { %v316_v37 = vpop.permute.xlu1 %315  ;;  %v306_v38 = vpop.permute.xlu0 %305 }
  0x88   :  { %v321_v39 = vpop.permute.xlu1 %320  ;;  %v311_v40 = vpop.permute.xlu0 %310 }
  0x8c   :  { %v677_v41 = vpop.permute.xlu1 %330  ;;  %v679_v42 = vpop.permute.xlu0 %325 }
  0x90   :  { %v681_v43 = vpop.permute.xlu1 %340  ;;  %v683_v44 = vpop.permute.xlu0 %335 }
  0x94   :  { %v351_v45 = vpop.permute.xlu1 %350  ;;  %v346_v46 = vpop.permute.xlu0 %345 }
  0x98   :  { %v361_v47 = vpop.permute.xlu1 %360  ;;  %v356_v48 = vpop.permute.xlu0 %355 }
  0x9c   :  { %v685_v49 = vpop.permute.xlu1 %370  ;;  %v687_v50 = vpop.permute.xlu0 %365 }
  0xa0   :  { %v381_v24 = vpop.permute.xlu1 %380  ;;  %v376_v25 = vpop.permute.xlu0 %375 }
  0xf5   :  { %v513_v51 = vpop.f32.mrb[0].mxu0  ;;  %v521_v53 = vpop.f32.mrb[0].mxu1 }
  0xf6   :  { %v385_v55 = vmul.f32 %v513_v51, %v316_v37  ;;  %v393_v56 = vmul.f32 %v521_v53, %v356_v48  ;;  %v157_v57 = vpop.f32.mrb[1].mxu0  ;;  %v189_v59 = vpop.f32.mrb[1].mxu1 }
  0xf7   :  { %v383_v62 = vmul.f32 %v306_v38, %v157_v57  ;;  %v391_v63 = vmul.f32 %v346_v46, %v189_v59  ;;  %v514_v0 = vpop.f32.mrb[2].mxu0  ;;  %v522_v2 = vpop.f32.mrb[2].mxu1 }
  0xf8   :  { %v417_v4 = vadd.f32 %v401_v52, %v385_v55  ;;  %v425_v5 = vadd.f32 %v409_v54, %v393_v56  ;;  %v386_v6 = vmul.f32 %v514_v0, %v321_v39  ;;  %v394_v7 = vmul.f32 %v522_v2, %v361_v47  ;;  %v160_v8 = vpop.f32.mrb[3].mxu0  ;;  %v192_v10 = vpop.f32.mrb[3].mxu1 }
  0xf9   :  { %v415_v12 = vadd.f32 %v399_v58, %v383_v62  ;;  %v423_v13 = vadd.f32 %v407_v60, %v391_v63  ;;  %v384_v14 = vmul.f32 %v311_v40, %v160_v8  ;;  %v392_v15 = vmul.f32 %v351_v45, %v192_v10 }
  0xfa   :  { %v435_v16 = vmul.f32 %v704_v61, %v417_v4  ;;  %v443_v17 = vmul.f32 %v704_v61, %v425_v5  ;;  %v418_v18 = vadd.f32 %v402_v1, %v386_v6  ;;  %v426_v19 = vadd.f32 %v410_v3, %v394_v7 }
  0xfb   :  { %v433_v20 = vmul.f32 %v704_v61, %v415_v12  ;;  %v441_v21 = vmul.f32 %v704_v61, %v423_v13  ;;  %v416_v22 = vadd.f32 %v400_v9, %v384_v14  ;;  %v424_v23 = vadd.f32 %v408_v11, %v392_v15 }
  0xfc   :  { %451 = vst [vmem:[%s817_s5 + $0x10] sm:$0xff] %v435_v16  ;;  %459 = vst [vmem:[%s817_s5 + $0x50] sm:$0xff] %v443_v17  ;;  %v436_v26 = vmul.f32 %v704_v61, %v418_v18  ;;  %v444_v27 = vmul.f32 %v704_v61, %v426_v19 }
  0xfd   :  { %449 = vst [vmem:[%s817_s5] sm:$0xff] %v433_v20  ;;  %457 = vst [vmem:[%s817_s5 + $0x40] sm:$0xff] %v441_v21  ;;  %v434_v28 = vmul.f32 %v704_v61, %v416_v22  ;;  %v442_v29 = vmul.f32 %v704_v61, %v424_v23  ;;  %v517_v30 = vpop.f32.mrb[4].mxu0  ;;  %v525_v32 = vpop.f32.mrb[4].mxu1 }
  0xfe   :  { %v389_v34 = vmul.f32 %v517_v30, %v683_v44  ;;  %v397_v35 = vmul.f32 %v525_v32, %v376_v25  ;;  %v173_v36 = vpop.f32.mrb[5].mxu0  ;;  %v205_v38 = vpop.f32.mrb[5].mxu1 }
  0xff   :  { %v387_v40 = vmul.f32 %v679_v42, %v173_v36  ;;  %v395_v44 = vmul.f32 %v687_v50, %v205_v38  ;;  %v518_v45 = vpop.f32.mrb[6].mxu0  ;;  %v526_v47 = vpop.f32.mrb[6].mxu1 }
 0x100   :  { %v390_v53 = vmul.f32 %v518_v45, %v681_v43  ;;  %v398_v54 = vmul.f32 %v526_v47, %v381_v24  ;;  %v176_v55 = vpop.f32.mrb[7].mxu0  ;;  %v208_v50 = vpop.f32.mrb[7].mxu1 }
 0x101   :  { %v388_v59 = vmul.f32 %v677_v41, %v176_v55  ;;  %v396_v60 = vmul.f32 %v685_v49, %v208_v50 }
 0x104   :  { %v405_v31 = vld [vmem:[%s815_s4 + $0x30] sm:$0xff] }
 0x105   :  { %v413_v33 = vld [vmem:[%s815_s4 + $0x70] sm:$0xff]  ;;  %v421_v51 = vadd.f32 %v405_v31, %v389_v34 }
 0x106   :  { %452 = vst [vmem:[%s817_s5 + $0x18] sm:$0xff] %v436_v26  ;;  %460 = vst [vmem:[%s817_s5 + $0x58] sm:$0xff] %v444_v27  ;;  %v429_v52 = vadd.f32 %v413_v33, %v397_v35 }
 0x107   :  { %v439_v62 = vmul.f32 %v704_v61, %v421_v51 }
 0x108   :  { %v447_v43 = vmul.f32 %v704_v61, %v429_v52 }
 0x10d   :  { %v403_v37 = vld [vmem:[%s815_s4 + $0x20] sm:$0xff] }
 0x10e   :  { %v411_v39 = vld [vmem:[%s815_s4 + $0x60] sm:$0xff]  ;;  %v419_v57 = vadd.f32 %v403_v37, %v387_v40 }
 0x10f   :  { %450 = vst [vmem:[%s817_s5 + $0x8] sm:$0xff] %v434_v28  ;;  %458 = vst [vmem:[%s817_s5 + $0x48] sm:$0xff] %v442_v29  ;;  %v427_v58 = vadd.f32 %v411_v39, %v395_v44 }
 0x110   :  { %v437_v1 = vmul.f32 %v704_v61, %v419_v57 }
 0x111   :  { %v445_v2 = vmul.f32 %v704_v61, %v427_v58 }
 0x116   :  { %v406_v46 = vld [vmem:[%s815_s4 + $0x38] sm:$0xff]  ;;  %v404_v42 = vld [vmem:[%s815_s4 + $0x28] sm:$0xff] }
 0x117   :  { %v414_v48 = vld [vmem:[%s815_s4 + $0x78] sm:$0xff]  ;;  %v412_v56 = vld [vmem:[%s815_s4 + $0x68] sm:$0xff]  ;;  %v422_v63 = vadd.f32 %v406_v46, %v390_v53  ;;  %v420_v3 = vadd.f32 %v404_v42, %v388_v59 }
 0x118   :  { %v430_v0 = vadd.f32 %v414_v48, %v398_v54  ;;  %v428_v4 = vadd.f32 %v412_v56, %v396_v60  ;;  %455 = vst [vmem:[%s817_s5 + $0x30] sm:$0xff] %v439_v62  ;;  %463 = vst [vmem:[%s817_s5 + $0x70] sm:$0xff] %v447_v43 }
 0x119   :  { %v440_v41 = vmul.f32 %v704_v61, %v422_v63  ;;  %453 = vst [vmem:[%s817_s5 + $0x20] sm:$0xff] %v437_v1  ;;  %461 = vst [vmem:[%s817_s5 + $0x60] sm:$0xff] %v445_v2  ;;  %v438_v5 = vmul.f32 %v704_v61, %v420_v3 }
 0x11a   :  { %v448_v49 = vmul.f32 %v704_v61, %v430_v0  ;;  %v446_v6 = vmul.f32 %v704_v61, %v428_v4 }
 0x11b   :  { %456 = vst [vmem:[%s817_s5 + $0x38] sm:$0xff] %v440_v41  ;;  %454 = vst [vmem:[%s817_s5 + $0x28] sm:$0xff] %v438_v5 }
 0x11c   :  { %464 = vst [vmem:[%s817_s5 + $0x78] sm:$0xff] %v448_v49  ;;  %462 = vst [vmem:[%s817_s5 + $0x68] sm:$0xff] %v446_v6 }

// kernel: _lightgcn_propagate.7
= control target key start
LH: loop header
LB: loop body
LE: loop exit
PB: predicated region body
PF: predicated region fallthrough
CT: control target
= control target key end

     0   :  { %v751_v1 = vmov 0   ;;  %s1026_s1 = inlined_call_operand.vmem [shape: s8[128,128], index: 1, kind: input, shape index: {}]   ;;  %s1027_s2 = inlined_call_operand.vmem [shape: bf16[128,128], index: 2, kind: input, shape index: {}]   ;;  %s1028_s3 = inlined_call_operand.vmem [shape: f32[128,1], index: 3, kind: input, shape index: {}]   ;;  %s1029_s4 = inlined_call_operand.vmem [shape: f32[128,128], index: 4, kind: input, shape index: {}, may-alias: {4,6}]   ;;  %s1030_s0 = inlined_call_operand.<no memory space> [shape: f32[1], index: 0, kind: input, shape index: {}]   ;;  %s1031_s6 = inlined_call_operand.vmem [shape: f32[128,128], index: 6, kind: output, shape index: {1}, may-alias: {4,6}]   ;;  %s1032_s5 = inlined_call_operand.vmem [shape: bf16[128,128], index: 5, kind: output, shape index: {0}]  }
   0x1   :  { %v65_v0 = vld [vmem:[%s1026_s1] sm:$0xff]  ;;  %741 = vset.pattern.permute.xlu1 %v751_v1  ;;  %v744_v5 = vld [vmem:[%s1027_s2 + $0x8] sm:$0xff]   ;;  %v745_v7 = vld [vmem:[%s1027_s2 + $0x10] sm:$0xff]   ;;  %v888_v59 = vstv %s1030_s0 }
   0x2   :  { %v69_v2 = vunpack.c.l.s8.bf16 %v65_v0  ;;  %v743_v3 = vld [vmem:[%s1027_s2] sm:$0xff]   ;;  %v70_v4 = vunpack.c.h.s8.bf16 %v65_v0  ;;  %v66_v6 = vld [vmem:[%s1026_s1 + $0x8] sm:$0xff]  ;;  %v746_v10 = vld [vmem:[%s1027_s2 + $0x18] sm:$0xff]  }
   0x3   :  { %692 = vmatprep.subr.bf16.mxu0 %v743_v3  ;;  %724 = vmatprep.subr.bf16.mxu1 %v743_v3  ;;  %v71_v8 = vunpack.c.l.s8.bf16 %v66_v6  ;;  %v289_v9 = vld [vmem:[%s1028_s3] sm:$0xff]  ;;  %v72_v11 = vunpack.c.h.s8.bf16 %v66_v6  ;;  %v67_v12 = vld [vmem:[%s1026_s1 + $0x10] sm:$0xff]  ;;  %v290_v13 = vld [vmem:[%s1028_s3 + $0x8] sm:$0xff] }
   0x4   :  { %77 = vxpose.xlu0.c.b16.start [1/8] %v69_v2, 128  ;;  %693 = vmatpush3.bf16.msra.mxu0 %v743_v3  ;;  %v747_v14 = vld [vmem:[%s1027_s2 + $0x20] sm:$0xff]   ;;  %v73_v15 = vunpack.c.l.s8.bf16 %v67_v12  ;;  %v291_v16 = vld [vmem:[%s1028_s3 + $0x10] sm:$0xff]  ;;  %v748_v17 = vld [vmem:[%s1027_s2 + $0x28] sm:$0xff]   ;;  %v74_v18 = vunpack.c.h.s8.bf16 %v67_v12 }
   0x5   :  { %732 = vmatpush3.bf16.msra.mxu1 %v743_v3  ;;  %694 = vmatprep.subr.bf16.mxu0 %v744_v5  ;;  %v68_v19 = vld [vmem:[%s1026_s1 + $0x18] sm:$0xff]  ;;  %v749_v21 = vld [vmem:[%s1027_s2 + $0x30] sm:$0xff]   ;;  %v293_v23 = vld [vmem:[%s1028_s3 + $0x20] sm:$0xff] }
   0x6   :  { %725 = vmatprep.subr.bf16.mxu1 %v744_v5  ;;  %323 = vperm.xlu1 %741, %v289_v9   ;;  %v292_v20 = vld [vmem:[%s1028_s3 + $0x18] sm:$0xff]  ;;  %v75_v22 = vunpack.c.l.s8.bf16 %v68_v19  ;;  %v76_v25 = vunpack.c.h.s8.bf16 %v68_v19  ;;  %v294_v26 = vld [vmem:[%s1028_s3 + $0x28] sm:$0xff]  ;;  %v295_v27 = vld [vmem:[%s1028_s3 + $0x30] sm:$0xff] }
   0x7   :  { %v750_v24 = vld [vmem:[%s1027_s2 + $0x38] sm:$0xff]   ;;  %v297_v29 = vld [vmem:[%s1028_s3 + $0x40] sm:$0xff]  ;;  %v298_v30 = vld [vmem:[%s1028_s3 + $0x48] sm:$0xff] }
   0x8   :  { %78 = vxpose.xlu0.c.b16.cont [2/8] %v70_v4, 128  ;;  %695 = vmatpush3.bf16.msra.mxu0 %v744_v5  ;;  %v296_v28 = vld [vmem:[%s1028_s3 + $0x38] sm:$0xff]  ;;  %v301_v31 = vld [vmem:[%s1028_s3 + $0x60] sm:$0xff]  ;;  %v299_v32 = vld [vmem:[%s1028_s3 + $0x50] sm:$0xff] }
   0x9   :  { %733 = vmatpush3.bf16.msra.mxu1 %v744_v5  ;;  %696 = vmatprep.subr.bf16.mxu0 %v745_v7  ;;  %v303_v33 = vld [vmem:[%s1028_s3 + $0x70] sm:$0xff]  ;;  %v300_v34 = vld [vmem:[%s1028_s3 + $0x58] sm:$0xff]  ;;  %v302_v35 = vld [vmem:[%s1028_s3 + $0x68] sm:$0xff] }
   0xa   :  { %726 = vmatprep.subr.bf16.mxu1 %v745_v7  ;;  %328 = vperm.xlu1 %741, %v290_v13   ;;  %v304_v36 = vld [vmem:[%s1028_s3 + $0x78] sm:$0xff]  ;;  %v515_v54 = vld [vmem:[%s1029_s4 + $0x10] sm:$0xff]  ;;  %v513_v57 = vld [vmem:[%s1029_s4] sm:$0xff] }
   0xb   :  { %v516_v62 = vld [vmem:[%s1029_s4 + $0x18] sm:$0xff]  ;;  %v514_v2 = vld [vmem:[%s1029_s4 + $0x8] sm:$0xff] }
   0xc   :  { %79 = vxpose.xlu0.c.b16.cont [3/8] %v71_v8, 128  ;;  %697 = vmatpush3.bf16.msra.mxu0 %v745_v7 }
   0xd   :  { %734 = vmatpush3.bf16.msra.mxu1 %v745_v7  ;;  %698 = vmatprep.subr.bf16.mxu0 %v746_v10 }
   0xe   :  { %727 = vmatprep.subr.bf16.mxu1 %v746_v10  ;;  %333 = vperm.xlu1 %741, %v291_v16  }
  0x10   :  { %80 = vxpose.xlu0.c.b16.cont [4/8] %v72_v11, 128  ;;  %699 = vmatpush3.bf16.msra.mxu0 %v746_v10 }
  0x11   :  { %735 = vmatpush3.bf16.msra.mxu1 %v746_v10  ;;  %700 = vmatprep.subr.bf16.mxu0 %v747_v14 }
  0x12   :  { %728 = vmatprep.subr.bf16.mxu1 %v747_v14  ;;  %338 = vperm.xlu1 %741, %v292_v20  }
  0x14   :  { %81 = vxpose.xlu0.c.b16.cont [5/8] %v73_v15, 128  ;;  %701 = vmatpush3.bf16.msra.mxu0 %v747_v14 }
  0x15   :  { %736 = vmatpush3.bf16.msra.mxu1 %v747_v14  ;;  %702 = vmatprep.subr.bf16.mxu0 %v748_v17 }
  0x16   :  { %729 = vmatprep.subr.bf16.mxu1 %v748_v17  ;;  %343 = vperm.xlu1 %741, %v293_v23  }
  0x18   :  { %82 = vxpose.xlu0.c.b16.cont [6/8] %v74_v18, 128  ;;  %703 = vmatpush3.bf16.msra.mxu0 %v748_v17 }
  0x19   :  { %737 = vmatpush3.bf16.msra.mxu1 %v748_v17  ;;  %704 = vmatprep.subr.bf16.mxu0 %v749_v21 }
  0x1a   :  { %730 = vmatprep.subr.bf16.mxu1 %v749_v21  ;;  %348 = vperm.xlu1 %741, %v294_v26  }
  0x1c   :  { %83 = vxpose.xlu0.c.b16.cont [7/8] %v75_v22, 128  ;;  %705 = vmatpush3.bf16.msra.mxu0 %v749_v21 }
  0x1d   :  { %738 = vmatpush3.bf16.msra.mxu1 %v749_v21  ;;  %706 = vmatprep.subr.bf16.mxu0 %v750_v24 }
  0x1e   :  { %731 = vmatprep.subr.bf16.mxu1 %v750_v24  ;;  %353 = vperm.xlu1 %741, %v295_v27  }
  0x20   :  { %84 = vxpose.xlu0.c.b16.end [8/8] %v76_v25, 128  ;;  %707 = vmatpush3.bf16.msra.mxu0 %v750_v24 }
  0x21   :  { %739 = vmatpush3.bf16.msra.mxu1 %v750_v24 }
  0x22   :  { %358 = vperm.xlu1 %741, %v296_v28  }
  0x26   :  { %368 = vperm.xlu1 %741, %v298_v30  }
  0x29   :  { %742 = vset.pattern.permute.xlu0 %v751_v1 }
  0x2a   :  { %363 = vperm.xlu0 %742, %v297_v29   ;;  %373 = vperm.xlu1 %741, %v299_v32  }
  0x2e   :  { %383 = vperm.xlu0 %742, %v301_v31   ;;  %378 = vperm.xlu1 %741, %v300_v34  }
  0x32   :  { %393 = vperm.xlu0 %742, %v303_v33   ;;  %388 = vperm.xlu1 %741, %v302_v35  }
  0x36   :  { %398 = vperm.xlu1 %741, %v304_v36  }
  0x6a   :  { %v85_v37 = vpop.trf.xlu0 }
  0x6b   :  { %708 = vmatprep.mubr.bf16.mxu0 %v85_v37 }
  0x6e   :  { %v86_v38 = vpop.trf.xlu0 }
  0x6f   :  { %709 = vmatmul.mubr.bf16.vlgmr.msra.gmra.mrb[0].mxu0 %v86_v38 }
  0x72   :  { %v87_v39 = vpop.trf.xlu0 }
  0x73   :  { %712 = vmatprep.mubr.bf16.mxu0 %v87_v39 }
  0x76   :  { %v88_v40 = vpop.trf.xlu0 }
  0x77   :  { %713 = vmatmul.mubr.bf16.gmra.mrb[4].mxu0 %v88_v40 }
  0x7a   :  { %v89_v41 = vpop.trf.xlu0 }
  0x7b   :  { %716 = vmatprep.mubr.bf16.mxu1 %v89_v41 }
  0x7e   :  { %v90_v42 = vpop.trf.xlu0 }
  0x7f   :  { %717 = vmatmul.mubr.bf16.vlgmr.msra.gmra.mrb[0].mxu1 %v90_v42 }
  0x82   :  { %v91_v43 = vpop.trf.xlu0 }
  0x83   :  { %720 = vmatprep.mubr.bf16.mxu1 %v91_v43 }
  0x85   :  { %v324_v45 = vpop.permute.xlu1 %323 }
  0x86   :  { %v92_v44 = vpop.trf.xlu0 }
  0x87   :  { %721 = vmatmul.mubr.bf16.gmra.mrb[4].mxu1 %v92_v44 }
  0x89   :  { %v329_v46 = vpop.permute.xlu1 %328 }
  0x8d   :  { %v334_v47 = vpop.permute.xlu1 %333 }
  0x91   :  { %v339_v48 = vpop.permute.xlu1 %338 }
  0x95   :  { %v873_v49 = vpop.permute.xlu1 %343 }
  0x99   :  { %v875_v50 = vpop.permute.xlu1 %348 }
  0x9d   :  { %v354_v51 = vpop.permute.xlu1 %353 }
  0xa1   :  { %v359_v52 = vpop.permute.xlu1 %358 }
  0xa5   :  { %v883_v58 = vpop.permute.xlu1 %368 }
  0xa9   :  { %v374_v15 = vpop.permute.xlu1 %373  ;;  %v364_v32 = vpop.permute.xlu0 %363 }
  0xad   :  { %v379_v37 = vpop.permute.xlu1 %378 }
 0x142   :  { %v710_v53 = vpop.f32.mrb[0].mxu0 }
 0x143   :  { %v403_v55 = vmul.f32 %v710_v53, %v334_v47  ;;  %v175_v56 = vpop.f32.mrb[1].mxu0 }
 0x144   :  { %v401_v60 = vmul.f32 %v324_v45, %v175_v56  ;;  %v711_v61 = vpop.f32.mrb[2].mxu0 }
 0x145   :  { %v531_v63 = vadd.f32 %v515_v54, %v403_v55  ;;  %v404_v0 = vmul.f32 %v711_v61, %v339_v48  ;;  %v178_v1 = vpop.f32.mrb[3].mxu0  ;;  %v419_v5 = vmul.f32 %v403_v55, %v334_v47  ;;  %v389_v61 = vpop.permute.xlu1 %388 }
 0x146   :  { %v529_v3 = vadd.f32 %v513_v57, %v401_v60  ;;  %v402_v4 = vmul.f32 %v329_v46, %v178_v1  ;;  %v417_v9 = vmul.f32 %v401_v60, %v324_v45 }
 0x147   :  { %v549_v6 = vmul.f32 %v888_v59, %v531_v63  ;;  %v420_v7 = vmul.f32 %v404_v0, %v339_v48  ;;  %v532_v8 = vadd.f32 %v516_v62, %v404_v0 }
 0x148   :  { %v547_v10 = vmul.f32 %v888_v59, %v529_v3  ;;  %v418_v11 = vmul.f32 %v402_v4, %v329_v46  ;;  %v530_v12 = vadd.f32 %v514_v2, %v402_v4 }
 0x149   :  { %565 = vst [vmem:[%s1031_s6 + $0x10] sm:$0xff] %v549_v6  ;;  %v637_v13 = vpack.c.bf16 %v420_v7, %v419_v5  ;;  %v550_v14 = vmul.f32 %v888_v59, %v532_v8 }
 0x14a   :  { %563 = vst [vmem:[%s1031_s6] sm:$0xff] %v547_v10  ;;  %v632_v16 = vpack.c.bf16 %v418_v11, %v417_v9  ;;  %v548_v17 = vmul.f32 %v888_v59, %v530_v12  ;;  %v714_v18 = vpop.f32.mrb[4].mxu0 }
 0x14b   :  { %669 = vst [vmem:[%s1032_s5 + $0x8] sm:$0xff] %v637_v13   ;;  %v407_v20 = vmul.f32 %v714_v18, %v354_v51  ;;  %v191_v21 = vpop.f32.mrb[5].mxu0 }
 0x14c   :  { %633 = vst [vmem:[%s1032_s5] sm:$0xff] %v632_v16   ;;  %v405_v23 = vmul.f32 %v873_v49, %v191_v21  ;;  %v715_v24 = vpop.f32.mrb[6].mxu0 }
 0x14d   :  { %v408_v27 = vmul.f32 %v715_v24, %v359_v52  ;;  %v194_v28 = vpop.f32.mrb[7].mxu0  ;;  %v423_v33 = vmul.f32 %v407_v20, %v354_v51  ;;  %v384_v51 = vpop.permute.xlu0 %383 }
 0x14e   :  { %v406_v31 = vmul.f32 %v875_v50, %v194_v28  ;;  %v421_v38 = vmul.f32 %v405_v23, %v873_v49 }
 0x14f   :  { %v424_v35 = vmul.f32 %v408_v27, %v359_v52 }
 0x150   :  { %v422_v40 = vmul.f32 %v406_v31, %v875_v50 }
 0x151   :  { %v519_v19 = vld [vmem:[%s1029_s4 + $0x30] sm:$0xff]  ;;  %v647_v42 = vpack.c.bf16 %v424_v35, %v423_v33  ;;  %v394_v12 = vpop.permute.xlu0 %393 }
 0x152   :  { %566 = vst [vmem:[%s1031_s6 + $0x18] sm:$0xff] %v550_v14  ;;  %v535_v26 = vadd.f32 %v519_v19, %v407_v20  ;;  %v642_v44 = vpack.c.bf16 %v422_v40, %v421_v38  ;;  %v718_v46 = vpop.f32.mrb[0].mxu1 }
 0x153   :  { %671 = vst [vmem:[%s1032_s5 + $0x18] sm:$0xff] %v647_v42   ;;  %v411_v48 = vmul.f32 %v718_v46, %v374_v15  ;;  %v207_v49 = vpop.f32.mrb[1].mxu1 }
 0x154   :  { %v553_v34 = vmul.f32 %v888_v59, %v535_v26  ;;  %670 = vst [vmem:[%s1032_s5 + $0x10] sm:$0xff] %v642_v44   ;;  %v409_v52 = vmul.f32 %v364_v32, %v207_v49  ;;  %v719_v53 = vpop.f32.mrb[2].mxu1 }
 0x155   :  { %v412_v56 = vmul.f32 %v719_v53, %v379_v37  ;;  %v210_v57 = vpop.f32.mrb[3].mxu1  ;;  %v427_v0 = vmul.f32 %v411_v48, %v374_v15 }
 0x156   :  { %v410_v63 = vmul.f32 %v883_v58, %v210_v57  ;;  %v425_v4 = vmul.f32 %v409_v52, %v364_v32 }
 0x157   :  { %v428_v2 = vmul.f32 %v412_v56, %v379_v37 }
 0x158   :  { %v426_v6 = vmul.f32 %v410_v63, %v883_v58 }
 0x159   :  { %v517_v22 = vld [vmem:[%s1029_s4 + $0x20] sm:$0xff]  ;;  %v657_v8 = vpack.c.bf16 %v428_v2, %v427_v0 }
 0x15a   :  { %564 = vst [vmem:[%s1031_s6 + $0x8] sm:$0xff] %v548_v17  ;;  %v533_v30 = vadd.f32 %v517_v22, %v405_v23  ;;  %v652_v10 = vpack.c.bf16 %v426_v6, %v425_v4  ;;  %v722_v13 = vpop.f32.mrb[4].mxu1  ;;  %v399_v17 = vpop.permute.xlu1 %398 }
 0x15b   :  { %673 = vst [vmem:[%s1032_s5 + $0x28] sm:$0xff] %v657_v8   ;;  %v415_v14 = vmul.f32 %v722_v13, %v394_v12  ;;  %v223_v15 = vpop.f32.mrb[5].mxu1 }
 0x15c   :  { %v551_v39 = vmul.f32 %v888_v59, %v533_v30  ;;  %672 = vst [vmem:[%s1032_s5 + $0x20] sm:$0xff] %v652_v10   ;;  %v413_v18 = vmul.f32 %v384_v51, %v223_v15  ;;  %v723_v19 = vpop.f32.mrb[6].mxu1 }
 0x15d   :  { %v416_v22 = vmul.f32 %v723_v19, %v399_v17  ;;  %v226_v23 = vpop.f32.mrb[7].mxu1 }
 0x15e   :  { %v414_v26 = vmul.f32 %v389_v61, %v226_v23 }
 0x160   :  { %v430_v33 = vmul.f32 %v414_v26, %v389_v61 }
 0x161   :  { %v520_v25 = vld [vmem:[%s1029_s4 + $0x38] sm:$0xff]  ;;  %v518_v29 = vld [vmem:[%s1029_s4 + $0x28] sm:$0xff] }
 0x162   :  { %v536_v36 = vadd.f32 %v520_v25, %v408_v27  ;;  %v534_v41 = vadd.f32 %v518_v29, %v406_v31  ;;  %569 = vst [vmem:[%s1031_s6 + $0x30] sm:$0xff] %v553_v34  ;;  %567 = vst [vmem:[%s1031_s6 + $0x20] sm:$0xff] %v551_v39  ;;  %v431_v27 = vmul.f32 %v415_v14, %v394_v12 }
 0x163   :  { %v432_v29 = vmul.f32 %v416_v22, %v399_v17  ;;  %v429_v31 = vmul.f32 %v413_v18, %v384_v51 }
 0x164   :  { %v554_v43 = vmul.f32 %v888_v59, %v536_v36  ;;  %v552_v45 = vmul.f32 %v888_v59, %v534_v41 }
 0x165   :  { %v667_v35 = vpack.c.bf16 %v432_v29, %v431_v27  ;;  %v662_v37 = vpack.c.bf16 %v430_v33, %v429_v31 }
 0x167   :  { %675 = vst [vmem:[%s1032_s5 + $0x38] sm:$0xff] %v667_v35   ;;  %674 = vst [vmem:[%s1032_s5 + $0x30] sm:$0xff] %v662_v37  }
 0x169   :  { %v523_v47 = vld [vmem:[%s1029_s4 + $0x50] sm:$0xff] }
 0x16a   :  { %570 = vst [vmem:[%s1031_s6 + $0x38] sm:$0xff] %v554_v43  ;;  %v539_v55 = vadd.f32 %v523_v47, %v411_v48 }
 0x16c   :  { %v557_v1 = vmul.f32 %v888_v59, %v539_v55 }
 0x171   :  { %v521_v50 = vld [vmem:[%s1029_s4 + $0x40] sm:$0xff] }
 0x172   :  { %568 = vst [vmem:[%s1031_s6 + $0x28] sm:$0xff] %v552_v45  ;;  %v537_v62 = vadd.f32 %v521_v50, %v409_v52 }
 0x174   :  { %v555_v5 = vmul.f32 %v888_v59, %v537_v62 }
 0x179   :  { %v524_v54 = vld [vmem:[%s1029_s4 + $0x58] sm:$0xff]  ;;  %v522_v60 = vld [vmem:[%s1029_s4 + $0x48] sm:$0xff] }
 0x17a   :  { %v540_v3 = vadd.f32 %v524_v54, %v412_v56  ;;  %v538_v7 = vadd.f32 %v522_v60, %v410_v63  ;;  %573 = vst [vmem:[%s1031_s6 + $0x50] sm:$0xff] %v557_v1  ;;  %571 = vst [vmem:[%s1031_s6 + $0x40] sm:$0xff] %v555_v5 }
 0x17c   :  { %v558_v9 = vmul.f32 %v888_v59, %v540_v3  ;;  %v556_v11 = vmul.f32 %v888_v59, %v538_v7 }
 0x181   :  { %v527_v58 = vld [vmem:[%s1029_s4 + $0x70] sm:$0xff] }
 0x182   :  { %574 = vst [vmem:[%s1031_s6 + $0x58] sm:$0xff] %v558_v9  ;;  %v543_v21 = vadd.f32 %v527_v58, %v415_v14 }
 0x184   :  { %v561_v28 = vmul.f32 %v888_v59, %v543_v21 }
 0x189   :  { %v525_v16 = vld [vmem:[%s1029_s4 + $0x60] sm:$0xff] }
 0x18a   :  { %572 = vst [vmem:[%s1031_s6 + $0x48] sm:$0xff] %v556_v11  ;;  %v541_v25 = vadd.f32 %v525_v16, %v413_v18 }
 0x18c   :  { %v559_v32 = vmul.f32 %v888_v59, %v541_v25 }
 0x191   :  { %v528_v20 = vld [vmem:[%s1029_s4 + $0x78] sm:$0xff]  ;;  %v526_v24 = vld [vmem:[%s1029_s4 + $0x68] sm:$0xff] }
 0x192   :  { %v544_v30 = vadd.f32 %v528_v20, %v416_v22  ;;  %v542_v34 = vadd.f32 %v526_v24, %v414_v26  ;;  %577 = vst [vmem:[%s1031_s6 + $0x70] sm:$0xff] %v561_v28  ;;  %575 = vst [vmem:[%s1031_s6 + $0x60] sm:$0xff] %v559_v32 }
 0x194   :  { %v562_v36 = vmul.f32 %v888_v59, %v544_v30  ;;  %v560_v38 = vmul.f32 %v888_v59, %v542_v34 }
 0x196   :  { %578 = vst [vmem:[%s1031_s6 + $0x78] sm:$0xff] %v562_v36  ;;  %576 = vst [vmem:[%s1031_s6 + $0x68] sm:$0xff] %v560_v38 }

// kernel: _lightgcn_propagate.11
= control target key start
LH: loop header
LB: loop body
LE: loop exit
PB: predicated region body
PF: predicated region fallthrough
CT: control target
= control target key end

     0   :  { %v570_v1 = vmov 0   ;;  %s807_s1 = inlined_call_operand.vmem [shape: s8[128,128], index: 1, kind: input, shape index: {}]   ;;  %s808_s2 = inlined_call_operand.vmem [shape: bf16[128,128], index: 2, kind: input, shape index: {}]   ;;  %s809_s3 = inlined_call_operand.vmem [shape: f32[128,1], index: 3, kind: input, shape index: {}]   ;;  %s810_s4 = inlined_call_operand.vmem [shape: f32[128,128], index: 4, kind: input, shape index: {}, may-alias: {4,5}]   ;;  %s811_s0 = inlined_call_operand.<no memory space> [shape: f32[1], index: 0, kind: input, shape index: {}]   ;;  %s812_s5 = inlined_call_operand.vmem [shape: f32[128,128], index: 5, kind: output, shape index: {}, may-alias: {4,5}]  }
   0x1   :  { %v63_v0 = vld [vmem:[%s807_s1] sm:$0xff]  ;;  %560 = vset.pattern.permute.xlu1 %v570_v1  ;;  %v563_v5 = vld [vmem:[%s808_s2 + $0x8] sm:$0xff]   ;;  %v564_v7 = vld [vmem:[%s808_s2 + $0x10] sm:$0xff]   ;;  %v698_v59 = vstv %s811_s0 }
   0x2   :  { %v67_v2 = vunpack.c.l.s8.bf16 %v63_v0  ;;  %v562_v3 = vld [vmem:[%s808_s2] sm:$0xff]   ;;  %v68_v4 = vunpack.c.h.s8.bf16 %v63_v0  ;;  %v64_v6 = vld [vmem:[%s807_s1 + $0x8] sm:$0xff]  ;;  %v565_v10 = vld [vmem:[%s808_s2 + $0x18] sm:$0xff]  }
   0x3   :  { %511 = vmatprep.subr.bf16.mxu0 %v562_v3  ;;  %543 = vmatprep.subr.bf16.mxu1 %v562_v3  ;;  %v69_v8 = vunpack.c.l.s8.bf16 %v64_v6  ;;  %v287_v9 = vld [vmem:[%s809_s3] sm:$0xff]  ;;  %v70_v11 = vunpack.c.h.s8.bf16 %v64_v6  ;;  %v65_v12 = vld [vmem:[%s807_s1 + $0x10] sm:$0xff]  ;;  %v288_v13 = vld [vmem:[%s809_s3 + $0x8] sm:$0xff] }
   0x4   :  { %75 = vxpose.xlu0.c.b16.start [1/8] %v67_v2, 128  ;;  %512 = vmatpush3.bf16.msra.mxu0 %v562_v3  ;;  %v566_v14 = vld [vmem:[%s808_s2 + $0x20] sm:$0xff]   ;;  %v71_v15 = vunpack.c.l.s8.bf16 %v65_v12  ;;  %v289_v16 = vld [vmem:[%s809_s3 + $0x10] sm:$0xff]  ;;  %v567_v17 = vld [vmem:[%s808_s2 + $0x28] sm:$0xff]   ;;  %v72_v18 = vunpack.c.h.s8.bf16 %v65_v12 }
   0x5   :  { %551 = vmatpush3.bf16.msra.mxu1 %v562_v3  ;;  %513 = vmatprep.subr.bf16.mxu0 %v563_v5  ;;  %v66_v19 = vld [vmem:[%s807_s1 + $0x18] sm:$0xff]  ;;  %v568_v21 = vld [vmem:[%s808_s2 + $0x30] sm:$0xff]   ;;  %v291_v23 = vld [vmem:[%s809_s3 + $0x20] sm:$0xff] }
   0x6   :  { %544 = vmatprep.subr.bf16.mxu1 %v563_v5  ;;  %321 = vperm.xlu1 %560, %v287_v9   ;;  %v290_v20 = vld [vmem:[%s809_s3 + $0x18] sm:$0xff]  ;;  %v73_v22 = vunpack.c.l.s8.bf16 %v66_v19  ;;  %v74_v25 = vunpack.c.h.s8.bf16 %v66_v19  ;;  %v292_v26 = vld [vmem:[%s809_s3 + $0x28] sm:$0xff]  ;;  %v293_v27 = vld [vmem:[%s809_s3 + $0x30] sm:$0xff] }
   0x7   :  { %v569_v24 = vld [vmem:[%s808_s2 + $0x38] sm:$0xff]   ;;  %v295_v29 = vld [vmem:[%s809_s3 + $0x40] sm:$0xff]  ;;  %v296_v30 = vld [vmem:[%s809_s3 + $0x48] sm:$0xff] }
   0x8   :  { %76 = vxpose.xlu0.c.b16.cont [2/8] %v68_v4, 128  ;;  %514 = vmatpush3.bf16.msra.mxu0 %v563_v5  ;;  %v294_v28 = vld [vmem:[%s809_s3 + $0x38] sm:$0xff]  ;;  %v299_v31 = vld [vmem:[%s809_s3 + $0x60] sm:$0xff]  ;;  %v297_v32 = vld [vmem:[%s809_s3 + $0x50] sm:$0xff] }
   0x9   :  { %552 = vmatpush3.bf16.msra.mxu1 %v563_v5  ;;  %515 = vmatprep.subr.bf16.mxu0 %v564_v7  ;;  %v301_v33 = vld [vmem:[%s809_s3 + $0x70] sm:$0xff]  ;;  %v298_v34 = vld [vmem:[%s809_s3 + $0x58] sm:$0xff]  ;;  %v300_v35 = vld [vmem:[%s809_s3 + $0x68] sm:$0xff] }
   0xa   :  { %545 = vmatprep.subr.bf16.mxu1 %v564_v7  ;;  %326 = vperm.xlu1 %560, %v288_v13   ;;  %v302_v36 = vld [vmem:[%s809_s3 + $0x78] sm:$0xff]  ;;  %v417_v54 = vld [vmem:[%s810_s4 + $0x10] sm:$0xff]  ;;  %v415_v57 = vld [vmem:[%s810_s4] sm:$0xff] }
   0xb   :  { %v418_v62 = vld [vmem:[%s810_s4 + $0x18] sm:$0xff]  ;;  %v416_v2 = vld [vmem:[%s810_s4 + $0x8] sm:$0xff] }
   0xc   :  { %77 = vxpose.xlu0.c.b16.cont [3/8] %v69_v8, 128  ;;  %516 = vmatpush3.bf16.msra.mxu0 %v564_v7 }
   0xd   :  { %553 = vmatpush3.bf16.msra.mxu1 %v564_v7  ;;  %517 = vmatprep.subr.bf16.mxu0 %v565_v10 }
   0xe   :  { %546 = vmatprep.subr.bf16.mxu1 %v565_v10  ;;  %331 = vperm.xlu1 %560, %v289_v16  }
  0x10   :  { %78 = vxpose.xlu0.c.b16.cont [4/8] %v70_v11, 128  ;;  %518 = vmatpush3.bf16.msra.mxu0 %v565_v10 }
  0x11   :  { %554 = vmatpush3.bf16.msra.mxu1 %v565_v10  ;;  %519 = vmatprep.subr.bf16.mxu0 %v566_v14 }
  0x12   :  { %547 = vmatprep.subr.bf16.mxu1 %v566_v14  ;;  %336 = vperm.xlu1 %560, %v290_v20  }
  0x14   :  { %79 = vxpose.xlu0.c.b16.cont [5/8] %v71_v15, 128  ;;  %520 = vmatpush3.bf16.msra.mxu0 %v566_v14 }
  0x15   :  { %555 = vmatpush3.bf16.msra.mxu1 %v566_v14  ;;  %521 = vmatprep.subr.bf16.mxu0 %v567_v17 }
  0x16   :  { %548 = vmatprep.subr.bf16.mxu1 %v567_v17  ;;  %341 = vperm.xlu1 %560, %v291_v23  }
  0x18   :  { %80 = vxpose.xlu0.c.b16.cont [6/8] %v72_v18, 128  ;;  %522 = vmatpush3.bf16.msra.mxu0 %v567_v17 }
  0x19   :  { %556 = vmatpush3.bf16.msra.mxu1 %v567_v17  ;;  %523 = vmatprep.subr.bf16.mxu0 %v568_v21 }
  0x1a   :  { %549 = vmatprep.subr.bf16.mxu1 %v568_v21  ;;  %346 = vperm.xlu1 %560, %v292_v26  }
  0x1c   :  { %81 = vxpose.xlu0.c.b16.cont [7/8] %v73_v22, 128  ;;  %524 = vmatpush3.bf16.msra.mxu0 %v568_v21 }
  0x1d   :  { %557 = vmatpush3.bf16.msra.mxu1 %v568_v21  ;;  %525 = vmatprep.subr.bf16.mxu0 %v569_v24 }
  0x1e   :  { %550 = vmatprep.subr.bf16.mxu1 %v569_v24  ;;  %351 = vperm.xlu1 %560, %v293_v27  }
  0x20   :  { %82 = vxpose.xlu0.c.b16.end [8/8] %v74_v25, 128  ;;  %526 = vmatpush3.bf16.msra.mxu0 %v569_v24 }
  0x21   :  { %558 = vmatpush3.bf16.msra.mxu1 %v569_v24 }
  0x22   :  { %356 = vperm.xlu1 %560, %v294_v28  }
  0x26   :  { %366 = vperm.xlu1 %560, %v296_v30  }
  0x29   :  { %561 = vset.pattern.permute.xlu0 %v570_v1 }
  0x2a   :  { %361 = vperm.xlu0 %561, %v295_v29   ;;  %371 = vperm.xlu1 %560, %v297_v32  }
  0x2e   :  { %381 = vperm.xlu0 %561, %v299_v31   ;;  %376 = vperm.xlu1 %560, %v298_v34  }
  0x32   :  { %391 = vperm.xlu0 %561, %v301_v33   ;;  %386 = vperm.xlu1 %560, %v300_v35  }
  0x36   :  { %396 = vperm.xlu1 %560, %v302_v36  }
  0x6a   :  { %v83_v37 = vpop.trf.xlu0 }
  0x6b   :  { %527 = vmatprep.mubr.bf16.mxu0 %v83_v37 }
  0x6e   :  { %v84_v38 = vpop.trf.xlu0 }
  0x6f   :  { %528 = vmatmul.mubr.bf16.vlgmr.msra.gmra.mrb[0].mxu0 %v84_v38 }
  0x72   :  { %v85_v39 = vpop.trf.xlu0 }
  0x73   :  { %531 = vmatprep.mubr.bf16.mxu0 %v85_v39 }
  0x76   :  { %v86_v40 = vpop.trf.xlu0 }
  0x77   :  { %532 = vmatmul.mubr.bf16.gmra.mrb[4].mxu0 %v86_v40 }
  0x7a   :  { %v87_v41 = vpop.trf.xlu0 }
  0x7b   :  { %535 = vmatprep.mubr.bf16.mxu1 %v87_v41 }
  0x7e   :  { %v88_v42 = vpop.trf.xlu0 }
  0x7f   :  { %536 = vmatmul.mubr.bf16.vlgmr.msra.gmra.mrb[0].mxu1 %v88_v42 }
  0x82   :  { %v89_v43 = vpop.trf.xlu0 }
  0x83   :  { %539 = vmatprep.mubr.bf16.mxu1 %v89_v43 }
  0x85   :  { %v322_v45 = vpop.permute.xlu1 %321 }
  0x86   :  { %v90_v44 = vpop.trf.xlu0 }
  0x87   :  { %540 = vmatmul.mubr.bf16.gmra.mrb[4].mxu1 %v90_v44 }
  0x89   :  { %v327_v46 = vpop.permute.xlu1 %326 }
  0x8d   :  { %v332_v47 = vpop.permute.xlu1 %331 }
  0x91   :  { %v337_v48 = vpop.permute.xlu1 %336 }
  0x95   :  { %v342_v49 = vpop.permute.xlu1 %341 }
  0x99   :  { %v347_v50 = vpop.permute.xlu1 %346 }
  0x9d   :  { %v352_v51 = vpop.permute.xlu1 %351 }
  0xa1   :  { %v357_v52 = vpop.permute.xlu1 %356 }
  0xa5   :  { %v693_v58 = vpop.permute.xlu1 %366 }
  0xa9   :  { %v372_v10 = vpop.permute.xlu1 %371  ;;  %v362_v26 = vpop.permute.xlu0 %361 }
  0xad   :  { %v377_v29 = vpop.permute.xlu1 %376  ;;  %v382_v39 = vpop.permute.xlu0 %381 }
 0x142   :  { %v529_v53 = vpop.f32.mrb[0].mxu0 }
 0x143   :  { %v401_v55 = vmul.f32 %v529_v53, %v332_v47  ;;  %v173_v56 = vpop.f32.mrb[1].mxu0  ;;  %v387_v47 = vpop.permute.xlu1 %386 }
 0x144   :  { %v399_v60 = vmul.f32 %v322_v45, %v173_v56  ;;  %v530_v61 = vpop.f32.mrb[2].mxu0  ;;  %v392_v56 = vpop.permute.xlu0 %391 }
 0x145   :  { %v433_v63 = vadd.f32 %v417_v54, %v401_v55  ;;  %v402_v0 = vmul.f32 %v530_v61, %v337_v48  ;;  %v176_v1 = vpop.f32.mrb[3].mxu0 }
 0x146   :  { %v431_v3 = vadd.f32 %v415_v57, %v399_v60  ;;  %v400_v4 = vmul.f32 %v327_v46, %v176_v1 }
 0x147   :  { %v451_v5 = vmul.f32 %v698_v59, %v433_v63  ;;  %v434_v6 = vadd.f32 %v418_v62, %v402_v0  ;;  %v397_v63 = vpop.permute.xlu1 %396 }
 0x148   :  { %v449_v7 = vmul.f32 %v698_v59, %v431_v3  ;;  %v432_v8 = vadd.f32 %v416_v2, %v400_v4 }
 0x149   :  { %467 = vst [vmem:[%s812_s5 + $0x10] sm:$0xff] %v451_v5  ;;  %v452_v9 = vmul.f32 %v698_v59, %v434_v6 }
 0x14a   :  { %465 = vst [vmem:[%s812_s5] sm:$0xff] %v449_v7  ;;  %v450_v11 = vmul.f32 %v698_v59, %v432_v8  ;;  %v533_v12 = vpop.f32.mrb[4].mxu0 }
 0x14b   :  { %v405_v14 = vmul.f32 %v533_v12, %v352_v51  ;;  %v189_v15 = vpop.f32.mrb[5].mxu0 }
 0x14c   :  { %v403_v17 = vmul.f32 %v342_v49, %v189_v15  ;;  %v534_v18 = vpop.f32.mrb[6].mxu0 }
 0x14d   :  { %v406_v21 = vmul.f32 %v534_v18, %v357_v52  ;;  %v192_v22 = vpop.f32.mrb[7].mxu0 }
 0x14e   :  { %v404_v25 = vmul.f32 %v347_v50, %v192_v22 }
 0x151   :  { %v421_v13 = vld [vmem:[%s810_s4 + $0x30] sm:$0xff] }
 0x152   :  { %468 = vst [vmem:[%s812_s5 + $0x18] sm:$0xff] %v452_v9  ;;  %v437_v20 = vadd.f32 %v421_v13, %v405_v14  ;;  %v537_v34 = vpop.f32.mrb[0].mxu1 }
 0x153   :  { %v409_v36 = vmul.f32 %v537_v34, %v372_v10  ;;  %v205_v37 = vpop.f32.mrb[1].mxu1 }
 0x154   :  { %v455_v27 = vmul.f32 %v698_v59, %v437_v20  ;;  %v407_v40 = vmul.f32 %v362_v26, %v205_v37  ;;  %v538_v41 = vpop.f32.mrb[2].mxu1 }
 0x155   :  { %v410_v44 = vmul.f32 %v538_v41, %v377_v29  ;;  %v208_v45 = vpop.f32.mrb[3].mxu1 }
 0x156   :  { %v408_v49 = vmul.f32 %v693_v58, %v208_v45 }
 0x159   :  { %v419_v16 = vld [vmem:[%s810_s4 + $0x20] sm:$0xff] }
 0x15a   :  { %466 = vst [vmem:[%s812_s5 + $0x8] sm:$0xff] %v450_v11  ;;  %v435_v24 = vadd.f32 %v419_v16, %v403_v17  ;;  %v541_v57 = vpop.f32.mrb[4].mxu1 }
 0x15b   :  { %v413_v60 = vmul.f32 %v541_v57, %v392_v56  ;;  %v221_v61 = vpop.f32.mrb[5].mxu1 }
 0x15c   :  { %v453_v30 = vmul.f32 %v698_v59, %v435_v24  ;;  %v411_v0 = vmul.f32 %v382_v39, %v221_v61  ;;  %v542_v1 = vpop.f32.mrb[6].mxu1 }
 0x15d   :  { %v414_v4 = vmul.f32 %v542_v1, %v397_v63  ;;  %v224_v5 = vpop.f32.mrb[7].mxu1 }
 0x15e   :  { %v412_v8 = vmul.f32 %v387_v47, %v224_v5 }
 0x161   :  { %v422_v19 = vld [vmem:[%s810_s4 + $0x38] sm:$0xff]  ;;  %v420_v23 = vld [vmem:[%s810_s4 + $0x28] sm:$0xff] }
 0x162   :  { %v438_v28 = vadd.f32 %v422_v19, %v406_v21  ;;  %v436_v31 = vadd.f32 %v420_v23, %v404_v25  ;;  %471 = vst [vmem:[%s812_s5 + $0x30] sm:$0xff] %v455_v27  ;;  %469 = vst [vmem:[%s812_s5 + $0x20] sm:$0xff] %v453_v30 }
 0x164   :  { %v456_v32 = vmul.f32 %v698_v59, %v438_v28  ;;  %v454_v33 = vmul.f32 %v698_v59, %v436_v31 }
 0x169   :  { %v425_v35 = vld [vmem:[%s810_s4 + $0x50] sm:$0xff] }
 0x16a   :  { %472 = vst [vmem:[%s812_s5 + $0x38] sm:$0xff] %v456_v32  ;;  %v441_v43 = vadd.f32 %v425_v35, %v409_v36 }
 0x16c   :  { %v459_v50 = vmul.f32 %v698_v59, %v441_v43 }
 0x171   :  { %v423_v38 = vld [vmem:[%s810_s4 + $0x40] sm:$0xff] }
 0x172   :  { %470 = vst [vmem:[%s812_s5 + $0x28] sm:$0xff] %v454_v33  ;;  %v439_v48 = vadd.f32 %v423_v38, %v407_v40 }
 0x174   :  { %v457_v52 = vmul.f32 %v698_v59, %v439_v48 }
 0x179   :  { %v426_v42 = vld [vmem:[%s810_s4 + $0x58] sm:$0xff]  ;;  %v424_v46 = vld [vmem:[%s810_s4 + $0x48] sm:$0xff] }
 0x17a   :  { %v442_v51 = vadd.f32 %v426_v42, %v410_v44  ;;  %v440_v53 = vadd.f32 %v424_v46, %v408_v49  ;;  %475 = vst [vmem:[%s812_s5 + $0x50] sm:$0xff] %v459_v50  ;;  %473 = vst [vmem:[%s812_s5 + $0x40] sm:$0xff] %v457_v52 }
 0x17c   :  { %v460_v54 = vmul.f32 %v698_v59, %v442_v51  ;;  %v458_v55 = vmul.f32 %v698_v59, %v440_v53 }
 0x181   :  { %v429_v58 = vld [vmem:[%s810_s4 + $0x70] sm:$0xff] }
 0x182   :  { %476 = vst [vmem:[%s812_s5 + $0x58] sm:$0xff] %v460_v54  ;;  %v445_v3 = vadd.f32 %v429_v58, %v413_v60 }
 0x184   :  { %v463_v9 = vmul.f32 %v698_v59, %v445_v3 }
 0x189   :  { %v427_v62 = vld [vmem:[%s810_s4 + $0x60] sm:$0xff] }
 0x18a   :  { %474 = vst [vmem:[%s812_s5 + $0x48] sm:$0xff] %v458_v55  ;;  %v443_v7 = vadd.f32 %v427_v62, %v411_v0 }
 0x18c   :  { %v461_v11 = vmul.f32 %v698_v59, %v443_v7 }
 0x191   :  { %v430_v2 = vld [vmem:[%s810_s4 + $0x78] sm:$0xff]  ;;  %v428_v6 = vld [vmem:[%s810_s4 + $0x68] sm:$0xff] }
 0x192   :  { %v446_v10 = vadd.f32 %v430_v2, %v414_v4  ;;  %v444_v12 = vadd.f32 %v428_v6, %v412_v8  ;;  %479 = vst [vmem:[%s812_s5 + $0x70] sm:$0xff] %v463_v9  ;;  %477 = vst [vmem:[%s812_s5 + $0x60] sm:$0xff] %v461_v11 }
 0x194   :  { %v464_v13 = vmul.f32 %v698_v59, %v446_v10  ;;  %v462_v14 = vmul.f32 %v698_v59, %v444_v12 }
 0x196   :  { %480 = vst [vmem:[%s812_s5 + $0x78] sm:$0xff] %v464_v13  ;;  %478 = vst [vmem:[%s812_s5 + $0x68] sm:$0xff] %v462_v14 }

</bundles_post_ra>
